<compile_context>
chip_gen: v6e
topology: v6e:2x2x1
jax: 0.10.0
libtpu: 0.0.40
codegen_flags: <defaults>
</compile_context>

<pallas_src>
import functools
import numpy as np
import jax
import jax.numpy as jnp
from jax import lax
from jax.experimental import pallas as pl
from jax.experimental.pallas import tpu as pltpu

BN_EPS = 1e-5


def _round_up(x, m):
    return ((x + m - 1) // m) * m


def _pad_rows(x, rows, value=0):
    pad = rows - x.shape[0]
    if pad == 0:
        return x
    cfg = ((0, pad),) + ((0, 0),) * (x.ndim - 1)
    return jnp.pad(x, cfg, constant_values=value)


def _vmem_limit_bytes():
    """Generation-aware scoped-VMEM limit (v5e/v6e: 128 MiB phys -> 96 MiB,
    v7x: 64 MiB phys -> 48 MiB)."""
    try:
        cap = int(pltpu.get_tpu_info().vmem_capacity_bytes)
    except Exception:
        cap = 64 * 1024 * 1024
    return int(min(cap * 3 // 4, 100 * 1024 * 1024))


def _pick_tile(requested, n_rows, per_row_bytes, budget_bytes):
    """Largest row tile (multiple of 16 -> bf16 sublane friendly) that fits the
    VMEM budget and keeps >= 2 grid steps (dual TensorCores on v7x)."""
    t = min(_round_up(requested, 16), _round_up(n_rows, 16))
    if n_rows > 16:
        t = min(t, _round_up((n_rows + 1) // 2, 16))
    while t > 16 and t * per_row_bytes > budget_bytes:
        t = _round_up(t // 2, 16)
    return max(t, 16)


# --------------------------------------------------------------------------
# Kernel 1: q / k / v projections (BN pre-folded)
#   q kept f32; k/v stored bf16 with rows >= N explicitly zeroed so the "-1
#   sentinel" row N gathers zeros (reference semantics) and no concat is needed.
# --------------------------------------------------------------------------
def qkv_kernel(feat_ref, wq_ref, bq_ref, wk_ref, bk_ref, wv_ref, bv_ref,
               q_ref, k_ref, v_ref, *, n_valid, tn):
    x = feat_ref[...]                                                   # (tn, C)
    q = jnp.maximum(jnp.dot(x, wq_ref[...], preferred_element_type=jnp.float32)
                    + bq_ref[...], 0.0)
    k = jnp.maximum(jnp.dot(x, wk_ref[...], preferred_element_type=jnp.float32)
                    + bk_ref[...], 0.0)
    v = jnp.dot(x, wv_ref[...], preferred_element_type=jnp.float32) + bv_ref[...]
    # rows >= n_valid (sentinel + padding) must be zero in k/v, otherwise invalid
    # neighbors would leak relu(bias) into the softmax denominator.
    row = pl.program_id(0) * tn + lax.broadcasted_iota(jnp.int32, (tn, 1), 0)
    live = (row < n_valid).astype(jnp.float32)
    q_ref[...] = q
    k_ref[...] = (k * live).astype(k_ref.dtype)
    v_ref[...] = (v * live).astype(v_ref.dtype)


# --------------------------------------------------------------------------
# Kernel 2: grouped vector attention hot path
#   pe-bias MLP (1st layer on VPU), relation, weight encoding at width G,
#   softmax over neighbors at width G, mask, group->channel expansion,
#   weighted neighbor reduction (lane-dense in C).
# --------------------------------------------------------------------------
def attn_kernel(q_ref, key_ref, val_ref, pos_ref, mask_ref,
                wp1_ref, bp1_ref, wp2_ref, bp2_ref,
                we1_ref, be1_ref, we2_ref, be2_ref, expand_ref,
                out_ref):
    f32 = jnp.float32
    q = q_ref[...]                                   # (TN, C) f32
    key = key_ref[...].astype(f32)                   # (TN, S, C) bf16 -> f32
    val = val_ref[...].astype(f32)                   # (TN, S, C) bf16 -> f32
    pos = pos_ref[...]                               # (TN, S, 3) f32
    mask = mask_ref[...]                             # (TN, S, 1) f32
    TN, S, C = key.shape
    G = we1_ref.shape[1]

    # ---- pe-bias MLP, first layer on the VPU (no padded K=3 MXU dot):
    #      h = relu(pos @ wp1 + bp1)   with BN folded into wp1/bp1
    wp1 = wp1_ref[...]                               # (3, C)
    h = (pos[:, :, 0:1] * wp1[0:1, :]
         + pos[:, :, 1:2] * wp1[1:2, :]
         + pos[:, :, 2:3] * wp1[2:3, :]
         + bp1_ref[...])
    h = jnp.maximum(h, 0.0)                          # (TN, S, C)
    peb = (jnp.dot(h.reshape(TN * S, C), wp2_ref[...],
                   preferred_element_type=f32)
           + bp2_ref[...]).reshape(TN, S, C)

    # ---- relation_qk and pe-biased value
    rel = key - q[:, None, :] + peb                  # (TN, S, C)
    val = val + peb                                  # (TN, S, C)

    # ---- weight encoding at group width G: Linear(C,G)[BN folded]+ReLU+Linear(G,G)
    hw = jnp.maximum(
        jnp.dot(rel.reshape(TN * S, C), we1_ref[...], preferred_element_type=f32)
        + be1_ref[...], 0.0)                         # (TN*S, G)
    wl = (jnp.dot(hw, we2_ref[...], preferred_element_type=f32)
          + be2_ref[...]).reshape(TN, S, G)

    # ---- softmax over neighbors (dim=1) at width G, then zero invalid neighbors
    #      (no renormalization -- matches the reference semantics: zeroed key/pos
    #       still contribute exp(logit) to the denominator)
    wl_max = jnp.max(wl, axis=1, keepdims=True)
    we = jnp.exp(wl - wl_max)
    inv = pl.reciprocal(jnp.sum(we, axis=1, keepdims=True), approx=True)
    wg = we * inv * mask                             # (TN, S, G)

    # ---- group -> channel expansion AFTER the softmax (one-hot (G,C) matmul),
    #      then the weighted neighbor reduction, lane-dense in C
    wc = jnp.dot(wg.reshape(TN * S, G), expand_ref[...],
                 preferred_element_type=f32).reshape(TN, S, C)
    out_ref[...] = jnp.sum(val * wc, axis=1)         # (TN, C)


# --------------------------------------------------------------------------
# Wrapper
# --------------------------------------------------------------------------
def grouped_vector_attention(feat, coord, reference_index, p, *, groups,
                             tile_rows=256, gather_dtype=jnp.bfloat16):
    N, C = feat.shape
    S = reference_index.shape[1]
    G = groups
    I = C // G
    f32 = jnp.float32

    # ----- fold eval-mode BN into the preceding Linear (exact algebra)
    wq = p["wq"] * p["qs"]; bq = p["bq"] * p["qs"] + p["qb"]
    wk = p["wk"] * p["ks"]; bk = p["bk"] * p["ks"] + p["kb"]
    wv, bv = p["wv"], p["bv"]
    wp1 = p["wp1"] * p["ps"]; bp1 = p["bp1"] * p["ps"] + p["pb"]
    wp2, bp2 = p["wp2"], p["bp2"]
    we1 = p["we1"] * p["ws"]; be1 = p["be1"] * p["ws"] + p["wb"]
    we2, be2 = p["we2"], p["be2"]
    # group -> channel one-hot expansion, applied after the softmax in kernel 2
    expand = (jnp.arange(C)[None, :] // I == jnp.arange(G)[:, None]).astype(f32)  # (G, C)

    # ----- generation-aware VMEM budget & shared row tile
    gbytes = jnp.dtype(gather_dtype).itemsize
    vmem_limit = _vmem_limit_bytes()
    w_bytes = 4 * (3 * C + C + C * C + C + C * G + G + G * G + G + G * C)
    per_row = (2 * (4 * C + 2 * gbytes * S * C + 12 * S + 4 * S + 4 * C)   # dbl-buffered I/O
               + 4 * S * C * 6 + 4 * S * G * 6)                            # in-kernel temporaries
    budget = max(vmem_limit - 2 * w_bytes - 4 * 1024 * 1024, 8 * 1024 * 1024)
    tn = _pick_tile(tile_rows, N + 1, per_row, budget)
    NP = _round_up(N + 1, tn)          # row N = explicit zero "-1 sentinel" row

    full = lambda i: (0, 0)
    row = lambda i: (i, 0)
    row3 = lambda i: (i, 0, 0)
    cparams = pltpu.CompilerParams(dimension_semantics=("parallel",),
                                   vmem_limit_bytes=vmem_limit)

    # ----- kernel 1: q/k/v projections
    feat_p = _pad_rows(feat, NP)
    ce1 = pl.CostEstimate(
        flops=6 * NP * C * C, transcendentals=0,
        bytes_accessed=NP * C * (4 + 4 + 2 * gbytes) + 3 * 4 * (C * C + C))
    q, k, v = pl.pallas_call(
        functools.partial(qkv_kernel, n_valid=N, tn=tn),
        out_shape=(jax.ShapeDtypeStruct((NP, C), f32),
                   jax.ShapeDtypeStruct((NP, C), gather_dtype),
                   jax.ShapeDtypeStruct((NP, C), gather_dtype)),
        grid=(NP // tn,),
        in_specs=[pl.BlockSpec((tn, C), row),
                  pl.BlockSpec((C, C), full), pl.BlockSpec((1, C), full),
                  pl.BlockSpec((C, C), full), pl.BlockSpec((1, C), full),
                  pl.BlockSpec((C, C), full), pl.BlockSpec((1, C), full)],
        out_specs=(pl.BlockSpec((tn, C), row),
                   pl.BlockSpec((tn, C), row),
                   pl.BlockSpec((tn, C), row)),
        compiler_params=cparams,
        cost_estimate=ce1,
    )(feat_p, wq, bq, wk, bk, wv, bv)

    # ----- glue: pointops.grouping equivalent (data-dependent gather stays in XLA,
    #       but now reads/writes bf16 and needs no slice / concat / pad copies).
    # TODO(synk): fuse this gather into kernel 2 (scalar-prefetched reference_index
    # + per-row pltpu.make_async_copy double-buffering); kept in XLA because the
    # per-neighbor rows are sub-cacheline DMAs at these channel widths.
    ref_p = _pad_rows(reference_index, NP, value=-1)                    # (NP, S)
    coord_p = _pad_rows(coord, NP)                                      # (NP, 3)
    idx = jnp.where(ref_p < 0, N, ref_p)                                # -1 -> sentinel row N
    mask = (ref_p >= 0).astype(f32)[..., None]                          # (NP, S, 1)
    key_g = k[idx]                                                      # (NP, S, C) bf16
    val_g = v[idx]                                                      # (NP, S, C) bf16
    pos = (coord[jnp.minimum(idx, N - 1)] - coord_p[:, None, :]) * mask  # (NP, S, 3) f32

    # ----- kernel 2: attention hot path
    n_pairs = NP * S
    ce2 = pl.CostEstimate(
        flops=2 * n_pairs * (C * C + C * G + G * G + G * C) + 14 * n_pairs * C,
        transcendentals=n_pairs * G + NP * G,
        bytes_accessed=(NP * C * 4 + 2 * n_pairs * C * gbytes + n_pairs * 16
                        + NP * C * 4 + w_bytes))
    out = pl.pallas_call(
        attn_kernel,
        out_shape=jax.ShapeDtypeStruct((NP, C), f32),
        grid=(NP // tn,),
        in_specs=[
            pl.BlockSpec((tn, C), row),
            pl.BlockSpec((tn, S, C), row3),
            pl.BlockSpec((tn, S, C), row3),
            pl.BlockSpec((tn, S, 3), row3),
            pl.BlockSpec((tn, S, 1), row3),
            pl.BlockSpec((3, C), full), pl.BlockSpec((1, C), full),
            pl.BlockSpec((C, C), full), pl.BlockSpec((1, C), full),
            pl.BlockSpec((C, G), full), pl.BlockSpec((1, G), full),
            pl.BlockSpec((G, G), full), pl.BlockSpec((1, G), full),
            pl.BlockSpec((G, C), full),
        ],
        out_specs=pl.BlockSpec((tn, C), row),
        compiler_params=cparams,
        cost_estimate=ce2,
    )(q, key_g, val_g, pos, mask,
      wp1, bp1, wp2, bp2, we1, be1, we2, be2, expand)
    # TODO(synk): for configs with C < 128 (e.g. this toy C=32), pad/pack the
    # channel dim so vreg lanes and output stores are dense.
    return out[:N]


# --------------------------------------------------------------------------
# Pure-JAX reference (same math) for a correctness check
# --------------------------------------------------------------------------
def reference(feat, coord, reference_index, p, *, groups):
    N, C = feat.shape
    q = jax.nn.relu((feat @ p["wq"] + p["bq"]) * p["qs"] + p["qb"])
    k = jax.nn.relu((feat @ p["wk"] + p["bk"]) * p["ks"] + p["kb"])
    v = feat @ p["wv"] + p["bv"]
    idx = jnp.where(reference_index < 0, N, reference_index)
    mask = (reference_index >= 0).astype(jnp.float32)
    coord_p = jnp.concatenate([coord, jnp.zeros((1, 3), jnp.float32)], 0)
    key_p = jnp.concatenate([k, jnp.zeros((1, C), jnp.float32)], 0)
    val_p = jnp.concatenate([v, jnp.zeros((1, C), jnp.float32)], 0)
    pos = (coord_p[idx] - coord[:, None, :]) * mask[..., None]
    key = key_p[idx] * mask[..., None]
    val = val_p[idx] * mask[..., None]
    rel = key - q[:, None, :]
    peb = jax.nn.relu((pos @ p["wp1"] + p["bp1"]) * p["ps"] + p["pb"]) @ p["wp2"] + p["bp2"]
    rel = rel + peb
    val = val + peb
    w = jax.nn.relu((rel @ p["we1"] + p["be1"]) * p["ws"] + p["wb"]) @ p["we2"] + p["be2"]
    w = jax.nn.softmax(w, axis=1)
    w = w * mask[..., None]
    I = C // groups
    val4 = val.reshape(N, -1, groups, I)
    return jnp.einsum("nsgi,nsg->ngi", val4, w).reshape(N, C)


# --------------------------------------------------------------------------
def make_params(key, C, G):
    ks = jax.random.split(key, 16)

    def lin(k, fi, fo):
        b = 1.0 / np.sqrt(fi)
        kw, kb = jax.random.split(k)
        w = jax.random.uniform(kw, (fi, fo), jnp.float32, -b, b)
        bias = jax.random.uniform(kb, (1, fo), jnp.float32, -b, b)
        return w, bias

    # eval-mode BatchNorm at fresh init: scale = 1/sqrt(1+eps), shift = 0
    bn_scale = lambda n: jnp.full((1, n), 1.0 / np.sqrt(1.0 + BN_EPS), jnp.float32)
    bn_shift = lambda n: jnp.zeros((1, n), jnp.float32)

    wq, bq = lin(ks[0], C, C)
    wk, bk = lin(ks[1], C, C)
    wv, bv = lin(ks[2], C, C)
    wp1, bp1 = lin(ks[3], 3, C)
    wp2, bp2 = lin(ks[4], C, C)
    we1, be1 = lin(ks[5], C, G)
    we2, be2 = lin(ks[6], G, G)
    return dict(
        wq=wq, bq=bq, qs=bn_scale(C), qb=bn_shift(C),
        wk=wk, bk=bk, ks=bn_scale(C), kb=bn_shift(C),
        wv=wv, bv=bv,
        wp1=wp1, bp1=bp1, ps=bn_scale(C), pb=bn_shift(C), wp2=wp2, bp2=bp2,
        we1=we1, be1=be1, ws=bn_scale(G), wb=bn_shift(G), we2=we2, be2=be2,
    )


if __name__ == "__main__":
    N, S, C, G = 16, 8, 32, 4      # points, neighbors, embed_channels, groups
    key0 = jax.random.PRNGKey(0)
    k_feat, k_coord, k_idx, k_par = jax.random.split(key0, 4)

    feat = jax.random.normal(k_feat, (N, C), jnp.float32)
    coord = jax.random.normal(k_coord, (N, 3), jnp.float32)
    # some entries are -1 (invalid neighbors), rest are valid point indices
    reference_index = jax.random.randint(k_idx, (N, S), -1, N, jnp.int32)
    params = make_params(k_par, C, G)

    fn = jax.jit(functools.partial(grouped_vector_attention, groups=G))
    out = jax.block_until_ready(fn(feat, coord, reference_index, params))

    ref = jax.block_until_ready(reference(feat, coord, reference_index, params, groups=G))
    assert out.shape == (N, C)
    # tolerance accounts for bf16 storage of the gathered key/value, the EUP
    # approximate reciprocal in the softmax, and MXU-vs-XLA f32 rounding
    np.testing.assert_allclose(np.asarray(out), np.asarray(ref), rtol=3e-2, atol=3e-2)

    # TODO(synk): attn_drop (Dropout, rate=0.0) is identity in eval mode and is omitted.
    print("KERNEL_OK")
</pallas_src>

<mosaic_0001>
module attributes {stable_mosaic.version = 11 : i64} {
  func.func @qkv_kernel(%arg0: i32, %arg1: memref<16x32xf32, #tpu.memory_space<vmem>>, %arg2: memref<32x32xf32, #tpu.memory_space<vmem>>, %arg3: memref<1x32xf32, #tpu.memory_space<vmem>>, %arg4: memref<32x32xf32, #tpu.memory_space<vmem>>, %arg5: memref<1x32xf32, #tpu.memory_space<vmem>>, %arg6: memref<32x32xf32, #tpu.memory_space<vmem>>, %arg7: memref<1x32xf32, #tpu.memory_space<vmem>>, %arg8: memref<16x32xf32, #tpu.memory_space<vmem>>, %arg9: memref<16x32xbf16, #tpu.memory_space<vmem>>, %arg10: memref<16x32xbf16, #tpu.memory_space<vmem>>) attributes {dimension_semantics = [#tpu.dimension_semantics<parallel>], iteration_bounds = array<i64: 2>, scalar_prefetch = 0 : i64, scratch_operands = 0 : i64, tpu.core_type = #tpu.core_type<tc>, window_params = [{transform_indices = @transform_0, window_bounds = array<i64: 16, 32>}, {pipeline_mode = #tpu.pipeline_mode<synchronous>, transform_indices = @transform_1, window_bounds = array<i64: 32, 32>}, {pipeline_mode = #tpu.pipeline_mode<synchronous>, transform_indices = @transform_2, window_bounds = array<i64: 1, 32>}, {pipeline_mode = #tpu.pipeline_mode<synchronous>, transform_indices = @transform_3, window_bounds = array<i64: 32, 32>}, {pipeline_mode = #tpu.pipeline_mode<synchronous>, transform_indices = @transform_4, window_bounds = array<i64: 1, 32>}, {pipeline_mode = #tpu.pipeline_mode<synchronous>, transform_indices = @transform_5, window_bounds = array<i64: 32, 32>}, {pipeline_mode = #tpu.pipeline_mode<synchronous>, transform_indices = @transform_6, window_bounds = array<i64: 1, 32>}, {transform_indices = @transform_7, window_bounds = array<i64: 16, 32>}, {transform_indices = @transform_8, window_bounds = array<i64: 16, 32>}, {transform_indices = @transform_9, window_bounds = array<i64: 16, 32>}]} {
    %c0 = arith.constant 0 : index
    %c0_0 = arith.constant 0 : index
    %0 = vector.load %arg1[%c0, %c0_0] : memref<16x32xf32, #tpu.memory_space<vmem>>, vector<16x32xf32>
    %c0_1 = arith.constant 0 : index
    %c0_2 = arith.constant 0 : index
    %1 = vector.load %arg2[%c0_1, %c0_2] : memref<32x32xf32, #tpu.memory_space<vmem>>, vector<32x32xf32>
    %cst = arith.constant dense<0.000000e+00> : vector<16x32xf32>
    %2 = tpu.matmul %0, %1, %cst {dimension_numbers = #tpu.dot_dimension_numbers<[1], [0], [0], [1], [0, 0, 1, 1], [], []>} : vector<16x32xf32>, vector<32x32xf32>, vector<16x32xf32> -> vector<16x32xf32>
    %c0_3 = arith.constant 0 : index
    %c0_4 = arith.constant 0 : index
    %3 = vector.load %arg3[%c0_3, %c0_4] : memref<1x32xf32, #tpu.memory_space<vmem>>, vector<1x32xf32>
    %4 = vector.broadcast %3 : vector<1x32xf32> to vector<16x32xf32>
    %5 = arith.addf %2, %4 : vector<16x32xf32>
    %cst_5 = arith.constant 0.000000e+00 : f32
    %6 = vector.broadcast %cst_5 : f32 to vector<16x32xf32>
    %7 = arith.maximumf %5, %6 : vector<16x32xf32>
    %c0_6 = arith.constant 0 : index
    %c0_7 = arith.constant 0 : index
    %8 = vector.load %arg4[%c0_6, %c0_7] : memref<32x32xf32, #tpu.memory_space<vmem>>, vector<32x32xf32>
    %cst_8 = arith.constant dense<0.000000e+00> : vector<16x32xf32>
    %9 = tpu.matmul %0, %8, %cst_8 {dimension_numbers = #tpu.dot_dimension_numbers<[1], [0], [0], [1], [0, 0, 1, 1], [], []>} : vector<16x32xf32>, vector<32x32xf32>, vector<16x32xf32> -> vector<16x32xf32>
    %c0_9 = arith.constant 0 : index
    %c0_10 = arith.constant 0 : index
    %10 = vector.load %arg5[%c0_9, %c0_10] : memref<1x32xf32, #tpu.memory_space<vmem>>, vector<1x32xf32>
    %11 = vector.broadcast %10 : vector<1x32xf32> to vector<16x32xf32>
    %12 = arith.addf %9, %11 : vector<16x32xf32>
    %cst_11 = arith.constant 0.000000e+00 : f32
    %13 = vector.broadcast %cst_11 : f32 to vector<16x32xf32>
    %14 = arith.maximumf %12, %13 : vector<16x32xf32>
    %c0_12 = arith.constant 0 : index
    %c0_13 = arith.constant 0 : index
    %15 = vector.load %arg6[%c0_12, %c0_13] : memref<32x32xf32, #tpu.memory_space<vmem>>, vector<32x32xf32>
    %cst_14 = arith.constant dense<0.000000e+00> : vector<16x32xf32>
    %16 = tpu.matmul %0, %15, %cst_14 {dimension_numbers = #tpu.dot_dimension_numbers<[1], [0], [0], [1], [0, 0, 1, 1], [], []>} : vector<16x32xf32>, vector<32x32xf32>, vector<16x32xf32> -> vector<16x32xf32>
    %c0_15 = arith.constant 0 : index
    %c0_16 = arith.constant 0 : index
    %17 = vector.load %arg7[%c0_15, %c0_16] : memref<1x32xf32, #tpu.memory_space<vmem>>, vector<1x32xf32>
    %18 = vector.broadcast %17 : vector<1x32xf32> to vector<16x32xf32>
    %19 = arith.addf %16, %18 : vector<16x32xf32>
    %c16_i32 = arith.constant 16 : i32
    %20 = arith.muli %arg0, %c16_i32 : i32
    %21 = tpu.iota {dimensions = array<i32: 0>} : vector<16x1xi32>
    %22 = vector.broadcast %20 : i32 to vector<16x1xi32>
    %23 = arith.addi %22, %21 : vector<16x1xi32>
    %c16_i32_17 = arith.constant 16 : i32
    %24 = vector.broadcast %c16_i32_17 : i32 to vector<16x1xi32>
    %25 = arith.cmpi slt, %23, %24 : vector<16x1xi32>
    %26 = arith.extui %25 : vector<16x1xi1> to vector<16x1xi32>
    %27 = arith.sitofp %26 : vector<16x1xi32> to vector<16x1xf32>
    %c0_18 = arith.constant 0 : index
    %c0_19 = arith.constant 0 : index
    %28 = vector.load %arg8[%c0_18, %c0_19] : memref<16x32xf32, #tpu.memory_space<vmem>>, vector<16x32xf32>
    tpu.vector_store %arg8[%c0_18, %c0_19], %7 {strides = array<i32>} : memref<16x32xf32, #tpu.memory_space<vmem>>, vector<16x32xf32>,
    %29 = vector.broadcast %27 : vector<16x1xf32> to vector<16x32xf32>
    %30 = arith.mulf %14, %29 : vector<16x32xf32>
    %31 = arith.truncf %30 : vector<16x32xf32> to vector<16x32xbf16>
    %c0_20 = arith.constant 0 : index
    %c0_21 = arith.constant 0 : index
    %32 = vector.load %arg9[%c0_20, %c0_21] : memref<16x32xbf16, #tpu.memory_space<vmem>>, vector<16x32xbf16>
    tpu.vector_store %arg9[%c0_20, %c0_21], %31 {strides = array<i32>} : memref<16x32xbf16, #tpu.memory_space<vmem>>, vector<16x32xbf16>,
    %33 = vector.broadcast %27 : vector<16x1xf32> to vector<16x32xf32>
    %34 = arith.mulf %19, %33 : vector<16x32xf32>
    %35 = arith.truncf %34 : vector<16x32xf32> to vector<16x32xbf16>
    %c0_22 = arith.constant 0 : index
    %c0_23 = arith.constant 0 : index
    %36 = vector.load %arg10[%c0_22, %c0_23] : memref<16x32xbf16, #tpu.memory_space<vmem>>, vector<16x32xbf16>
    tpu.vector_store %arg10[%c0_22, %c0_23], %35 {strides = array<i32>} : memref<16x32xbf16, #tpu.memory_space<vmem>>, vector<16x32xbf16>,
    return
  }
  func.func @transform_0(%arg0: i32) -> (i32, i32) {
    %c0_i32 = arith.constant 0 : i32
    %c0_i32_0 = arith.constant 0 : i32
    return %arg0, %c0_i32 : i32, i32
  }
  func.func @transform_1(%arg0: i32) -> (i32, i32) {
    %c0_i32 = arith.constant 0 : i32
    %c0_i32_0 = arith.constant 0 : i32
    %c0_i32_1 = arith.constant 0 : i32
    return %c0_i32, %c0_i32_0 : i32, i32
  }
  func.func @transform_2(%arg0: i32) -> (i32, i32) {
    %c0_i32 = arith.constant 0 : i32
    %c0_i32_0 = arith.constant 0 : i32
    %c0_i32_1 = arith.constant 0 : i32
    return %c0_i32, %c0_i32_0 : i32, i32
  }
  func.func @transform_3(%arg0: i32) -> (i32, i32) {
    %c0_i32 = arith.constant 0 : i32
    %c0_i32_0 = arith.constant 0 : i32
    %c0_i32_1 = arith.constant 0 : i32
    return %c0_i32, %c0_i32_0 : i32, i32
  }
  func.func @transform_4(%arg0: i32) -> (i32, i32) {
    %c0_i32 = arith.constant 0 : i32
    %c0_i32_0 = arith.constant 0 : i32
    %c0_i32_1 = arith.constant 0 : i32
    return %c0_i32, %c0_i32_0 : i32, i32
  }
  func.func @transform_5(%arg0: i32) -> (i32, i32) {
    %c0_i32 = arith.constant 0 : i32
    %c0_i32_0 = arith.constant 0 : i32
    %c0_i32_1 = arith.constant 0 : i32
    return %c0_i32, %c0_i32_0 : i32, i32
  }
  func.func @transform_6(%arg0: i32) -> (i32, i32) {
    %c0_i32 = arith.constant 0 : i32
    %c0_i32_0 = arith.constant 0 : i32
    %c0_i32_1 = arith.constant 0 : i32
    return %c0_i32, %c0_i32_0 : i32, i32
  }
  func.func @transform_7(%arg0: i32) -> (i32, i32) {
    %c0_i32 = arith.constant 0 : i32
    %c0_i32_0 = arith.constant 0 : i32
    return %arg0, %c0_i32 : i32, i32
  }
  func.func @transform_8(%arg0: i32) -> (i32, i32) {
    %c0_i32 = arith.constant 0 : i32
    %c0_i32_0 = arith.constant 0 : i32
    return %arg0, %c0_i32 : i32, i32
  }
  func.func @transform_9(%arg0: i32) -> (i32, i32) {
    %c0_i32 = arith.constant 0 : i32
    %c0_i32_0 = arith.constant 0 : i32
    return %arg0, %c0_i32 : i32, i32
  }
}

module attributes {stable_mosaic.version = 11 : i64} {
  func.func @attn_kernel(%arg0: i32, %arg1: memref<16x32xf32, #tpu.memory_space<vmem>>, %arg2: memref<16x8x32xbf16, #tpu.memory_space<vmem>>, %arg3: memref<16x8x32xbf16, #tpu.memory_space<vmem>>, %arg4: memref<16x8x3xf32, #tpu.memory_space<vmem>>, %arg5: memref<16x8x1xf32, #tpu.memory_space<vmem>>, %arg6: memref<3x32xf32, #tpu.memory_space<vmem>>, %arg7: memref<1x32xf32, #tpu.memory_space<vmem>>, %arg8: memref<32x32xf32, #tpu.memory_space<vmem>>, %arg9: memref<1x32xf32, #tpu.memory_space<vmem>>, %arg10: memref<32x4xf32, #tpu.memory_space<vmem>>, %arg11: memref<1x4xf32, #tpu.memory_space<vmem>>, %arg12: memref<4x4xf32, #tpu.memory_space<vmem>>, %arg13: memref<1x4xf32, #tpu.memory_space<vmem>>, %arg14: memref<4x32xf32, #tpu.memory_space<vmem>>, %arg15: memref<16x32xf32, #tpu.memory_space<vmem>>) attributes {dimension_semantics = [#tpu.dimension_semantics<parallel>], iteration_bounds = array<i64: 2>, scalar_prefetch = 0 : i64, scratch_operands = 0 : i64, tpu.core_type = #tpu.core_type<tc>, window_params = [{transform_indices = @transform_0, window_bounds = array<i64: 16, 32>}, {transform_indices = @transform_1, window_bounds = array<i64: 16, 8, 32>}, {transform_indices = @transform_2, window_bounds = array<i64: 16, 8, 32>}, {transform_indices = @transform_3, window_bounds = array<i64: 16, 8, 3>}, {transform_indices = @transform_4, window_bounds = array<i64: 16, 8, 1>}, {pipeline_mode = #tpu.pipeline_mode<synchronous>, transform_indices = @transform_5, window_bounds = array<i64: 3, 32>}, {pipeline_mode = #tpu.pipeline_mode<synchronous>, transform_indices = @transform_6, window_bounds = array<i64: 1, 32>}, {pipeline_mode = #tpu.pipeline_mode<synchronous>, transform_indices = @transform_7, window_bounds = array<i64: 32, 32>}, {pipeline_mode = #tpu.pipeline_mode<synchronous>, transform_indices = @transform_8, window_bounds = array<i64: 1, 32>}, {pipeline_mode = #tpu.pipeline_mode<synchronous>, transform_indices = @transform_9, window_bounds = array<i64: 32, 4>}, {pipeline_mode = #tpu.pipeline_mode<synchronous>, transform_indices = @transform_10, window_bounds = array<i64: 1, 4>}, {pipeline_mode = #tpu.pipeline_mode<synchronous>, transform_indices = @transform_11, window_bounds = array<i64: 4, 4>}, {pipeline_mode = #tpu.pipeline_mode<synchronous>, transform_indices = @transform_12, window_bounds = array<i64: 1, 4>}, {pipeline_mode = #tpu.pipeline_mode<synchronous>, transform_indices = @transform_13, window_bounds = array<i64: 4, 32>}, {transform_indices = @transform_14, window_bounds = array<i64: 16, 32>}]} {
    %c0 = arith.constant 0 : index
    %c0_0 = arith.constant 0 : index
    %0 = vector.load %arg1[%c0, %c0_0] : memref<16x32xf32, #tpu.memory_space<vmem>>, vector<16x32xf32>
    %c0_1 = arith.constant 0 : index
    %c0_2 = arith.constant 0 : index
    %c0_3 = arith.constant 0 : index
    %1 = vector.load %arg2[%c0_1, %c0_2, %c0_3] : memref<16x8x32xbf16, #tpu.memory_space<vmem>>, vector<16x8x32xbf16>
    %2 = arith.extf %1 : vector<16x8x32xbf16> to vector<16x8x32xf32>
    %c0_4 = arith.constant 0 : index
    %c0_5 = arith.constant 0 : index
    %c0_6 = arith.constant 0 : index
    %3 = vector.load %arg3[%c0_4, %c0_5, %c0_6] : memref<16x8x32xbf16, #tpu.memory_space<vmem>>, vector<16x8x32xbf16>
    %4 = arith.extf %3 : vector<16x8x32xbf16> to vector<16x8x32xf32>
    %c0_7 = arith.constant 0 : index
    %c0_8 = arith.constant 0 : index
    %c0_9 = arith.constant 0 : index
    %5 = vector.load %arg4[%c0_7, %c0_8, %c0_9] : memref<16x8x3xf32, #tpu.memory_space<vmem>>, vector<16x8x3xf32>
    %c0_10 = arith.constant 0 : index
    %c0_11 = arith.constant 0 : index
    %c0_12 = arith.constant 0 : index
    %6 = vector.load %arg5[%c0_10, %c0_11, %c0_12] : memref<16x8x1xf32, #tpu.memory_space<vmem>>, vector<16x8x1xf32>
    %c0_13 = arith.constant 0 : index
    %c0_14 = arith.constant 0 : index
    %7 = vector.load %arg6[%c0_13, %c0_14] : memref<3x32xf32, #tpu.memory_space<vmem>>, vector<3x32xf32>
    %8 = vector.extract_strided_slice %5 {offsets = [0, 0, 0], sizes = [16, 8, 1], strides = [1, 1, 1]} : vector<16x8x3xf32> to vector<16x8x1xf32>
    %9 = vector.extract_strided_slice %7 {offsets = [0, 0], sizes = [1, 32], strides = [1, 1]} : vector<3x32xf32> to vector<1x32xf32>
    %10 = vector.shape_cast %9 : vector<1x32xf32> to vector<1x1x32xf32>
    %11 = vector.broadcast %8 : vector<16x8x1xf32> to vector<16x8x32xf32>
    %12 = vector.broadcast %10 : vector<1x1x32xf32> to vector<16x8x32xf32>
    %13 = arith.mulf %11, %12 : vector<16x8x32xf32>
    %14 = vector.extract_strided_slice %5 {offsets = [0, 0, 1], sizes = [16, 8, 1], strides = [1, 1, 1]} : vector<16x8x3xf32> to vector<16x8x1xf32>
    %15 = vector.extract_strided_slice %7 {offsets = [1, 0], sizes = [1, 32], strides = [1, 1]} : vector<3x32xf32> to vector<1x32xf32>
    %16 = vector.shape_cast %15 : vector<1x32xf32> to vector<1x1x32xf32>
    %17 = vector.broadcast %14 : vector<16x8x1xf32> to vector<16x8x32xf32>
    %18 = vector.broadcast %16 : vector<1x1x32xf32> to vector<16x8x32xf32>
    %19 = arith.mulf %17, %18 : vector<16x8x32xf32>
    %20 = arith.addf %13, %19 : vector<16x8x32xf32>
    %21 = vector.extract_strided_slice %5 {offsets = [0, 0, 2], sizes = [16, 8, 1], strides = [1, 1, 1]} : vector<16x8x3xf32> to vector<16x8x1xf32>
    %22 = vector.extract_strided_slice %7 {offsets = [2, 0], sizes = [1, 32], strides = [1, 1]} : vector<3x32xf32> to vector<1x32xf32>
    %23 = vector.shape_cast %22 : vector<1x32xf32> to vector<1x1x32xf32>
    %24 = vector.broadcast %21 : vector<16x8x1xf32> to vector<16x8x32xf32>
    %25 = vector.broadcast %23 : vector<1x1x32xf32> to vector<16x8x32xf32>
    %26 = arith.mulf %24, %25 : vector<16x8x32xf32>
    %27 = arith.addf %20, %26 : vector<16x8x32xf32>
    %c0_15 = arith.constant 0 : index
    %c0_16 = arith.constant 0 : index
    %28 = vector.load %arg7[%c0_15, %c0_16] : memref<1x32xf32, #tpu.memory_space<vmem>>, vector<1x32xf32>
    %29 = vector.shape_cast %28 : vector<1x32xf32> to vector<1x1x32xf32>
    %30 = vector.broadcast %29 : vector<1x1x32xf32> to vector<16x8x32xf32>
    %31 = arith.addf %27, %30 : vector<16x8x32xf32>
    %cst = arith.constant 0.000000e+00 : f32
    %32 = vector.broadcast %cst : f32 to vector<16x8x32xf32>
    %33 = arith.maximumf %31, %32 : vector<16x8x32xf32>
    %34 = vector.shape_cast %33 : vector<16x8x32xf32> to vector<128x32xf32>
    %c0_17 = arith.constant 0 : index
    %c0_18 = arith.constant 0 : index
    %35 = vector.load %arg8[%c0_17, %c0_18] : memref<32x32xf32, #tpu.memory_space<vmem>>, vector<32x32xf32>
    %cst_19 = arith.constant dense<0.000000e+00> : vector<128x32xf32>
    %36 = tpu.matmul %34, %35, %cst_19 {dimension_numbers = #tpu.dot_dimension_numbers<[1], [0], [0], [1], [0, 0, 1, 1], [], []>} : vector<128x32xf32>, vector<32x32xf32>, vector<128x32xf32> -> vector<128x32xf32>
    %c0_20 = arith.constant 0 : index
    %c0_21 = arith.constant 0 : index
    %37 = vector.load %arg9[%c0_20, %c0_21] : memref<1x32xf32, #tpu.memory_space<vmem>>, vector<1x32xf32>
    %38 = vector.broadcast %37 : vector<1x32xf32> to vector<128x32xf32>
    %39 = arith.addf %36, %38 : vector<128x32xf32>
    %40 = vector.shape_cast %39 : vector<128x32xf32> to vector<16x8x32xf32>
    %41 = vector.shape_cast %0 : vector<16x32xf32> to vector<16x1x32xf32>
    %42 = vector.broadcast %41 : vector<16x1x32xf32> to vector<16x8x32xf32>
    %43 = arith.subf %2, %42 : vector<16x8x32xf32>
    %44 = arith.addf %43, %40 : vector<16x8x32xf32>
    %45 = arith.addf %4, %40 : vector<16x8x32xf32>
    %46 = vector.shape_cast %44 : vector<16x8x32xf32> to vector<128x32xf32>
    %c0_22 = arith.constant 0 : index
    %c0_23 = arith.constant 0 : index
    %47 = vector.load %arg10[%c0_22, %c0_23] : memref<32x4xf32, #tpu.memory_space<vmem>>, vector<32x4xf32>
    %cst_24 = arith.constant dense<0.000000e+00> : vector<128x4xf32>
    %48 = tpu.matmul %46, %47, %cst_24 {dimension_numbers = #tpu.dot_dimension_numbers<[1], [0], [0], [1], [0, 0, 1, 1], [], []>} : vector<128x32xf32>, vector<32x4xf32>, vector<128x4xf32> -> vector<128x4xf32>
    %c0_25 = arith.constant 0 : index
    %c0_26 = arith.constant 0 : index
    %49 = vector.load %arg11[%c0_25, %c0_26] : memref<1x4xf32, #tpu.memory_space<vmem>>, vector<1x4xf32>
    %50 = vector.broadcast %49 : vector<1x4xf32> to vector<128x4xf32>
    %51 = arith.addf %48, %50 : vector<128x4xf32>
    %cst_27 = arith.constant 0.000000e+00 : f32
    %52 = vector.broadcast %cst_27 : f32 to vector<128x4xf32>
    %53 = arith.maximumf %51, %52 : vector<128x4xf32>
    %c0_28 = arith.constant 0 : index
    %c0_29 = arith.constant 0 : index
    %54 = vector.load %arg12[%c0_28, %c0_29] : memref<4x4xf32, #tpu.memory_space<vmem>>, vector<4x4xf32>
    %cst_30 = arith.constant dense<0.000000e+00> : vector<128x4xf32>
    %55 = tpu.matmul %53, %54, %cst_30 {dimension_numbers = #tpu.dot_dimension_numbers<[1], [0], [0], [1], [0, 0, 1, 1], [], []>} : vector<128x4xf32>, vector<4x4xf32>, vector<128x4xf32> -> vector<128x4xf32>
    %c0_31 = arith.constant 0 : index
    %c0_32 = arith.constant 0 : index
    %56 = vector.load %arg13[%c0_31, %c0_32] : memref<1x4xf32, #tpu.memory_space<vmem>>, vector<1x4xf32>
    %57 = vector.broadcast %56 : vector<1x4xf32> to vector<128x4xf32>
    %58 = arith.addf %55, %57 : vector<128x4xf32>
    %59 = vector.shape_cast %58 : vector<128x4xf32> to vector<16x8x4xf32>
    %cst_33 = arith.constant dense<0xFF800000> : vector<16x4xf32>
    %60 = vector.multi_reduction <maximumf>, %59, %cst_33 [1] : vector<16x8x4xf32> to vector<16x4xf32>
    %61 = vector.shape_cast %60 : vector<16x4xf32> to vector<16x1x4xf32>
    %62 = vector.broadcast %61 : vector<16x1x4xf32> to vector<16x8x4xf32>
    %63 = arith.subf %59, %62 : vector<16x8x4xf32>
    %64 = math.exp %63 : vector<16x8x4xf32>
    %cst_34 = arith.constant dense<0.000000e+00> : vector<16x4xf32>
    %65 = vector.multi_reduction <add>, %64, %cst_34 [1] : vector<16x8x4xf32> to vector<16x4xf32>
    %66 = vector.shape_cast %65 : vector<16x4xf32> to vector<16x1x4xf32>
    %67 = tpu.reciprocal %66 {approx = true} : vector<16x1x4xf32> -> vector<16x1x4xf32>
    %68 = vector.broadcast %67 : vector<16x1x4xf32> to vector<16x8x4xf32>
    %69 = arith.mulf %64, %68 : vector<16x8x4xf32>
    %70 = vector.broadcast %6 : vector<16x8x1xf32> to vector<16x8x4xf32>
    %71 = arith.mulf %69, %70 : vector<16x8x4xf32>
    %72 = vector.shape_cast %71 : vector<16x8x4xf32> to vector<128x4xf32>
    %c0_35 = arith.constant 0 : index
    %c0_36 = arith.constant 0 : index
    %73 = vector.load %arg14[%c0_35, %c0_36] : memref<4x32xf32, #tpu.memory_space<vmem>>, vector<4x32xf32>
    %cst_37 = arith.constant dense<0.000000e+00> : vector<128x32xf32>
    %74 = tpu.matmul %72, %73, %cst_37 {dimension_numbers = #tpu.dot_dimension_numbers<[1], [0], [0], [1], [0, 0, 1, 1], [], []>} : vector<128x4xf32>, vector<4x32xf32>, vector<128x32xf32> -> vector<128x32xf32>
    %75 = vector.shape_cast %74 : vector<128x32xf32> to vector<16x8x32xf32>
    %76 = arith.mulf %45, %75 : vector<16x8x32xf32>
    %cst_38 = arith.constant dense<0.000000e+00> : vector<16x32xf32>
    %77 = vector.multi_reduction <add>, %76, %cst_38 [1] : vector<16x8x32xf32> to vector<16x32xf32>
    %c0_39 = arith.constant 0 : index
    %c0_40 = arith.constant 0 : index
    %78 = vector.load %arg15[%c0_39, %c0_40] : memref<16x32xf32, #tpu.memory_space<vmem>>, vector<16x32xf32>
    tpu.vector_store %arg15[%c0_39, %c0_40], %77 {strides = array<i32>} : memref<16x32xf32, #tpu.memory_space<vmem>>, vector<16x32xf32>,
    return
  }
  func.func @transform_0(%arg0: i32) -> (i32, i32) {
    %c0_i32 = arith.constant 0 : i32
    %c0_i32_0 = arith.constant 0 : i32
    return %arg0, %c0_i32 : i32, i32
  }
  func.func @transform_1(%arg0: i32) -> (i32, i32, i32) {
    %c0_i32 = arith.constant 0 : i32
    %c0_i32_0 = arith.constant 0 : i32
    %c0_i32_1 = arith.constant 0 : i32
    return %arg0, %c0_i32, %c0_i32_0 : i32, i32, i32
  }
  func.func @transform_2(%arg0: i32) -> (i32, i32, i32) {
    %c0_i32 = arith.constant 0 : i32
    %c0_i32_0 = arith.constant 0 : i32
    %c0_i32_1 = arith.constant 0 : i32
    return %arg0, %c0_i32, %c0_i32_0 : i32, i32, i32
  }
  func.func @transform_3(%arg0: i32) -> (i32, i32, i32) {
    %c0_i32 = arith.constant 0 : i32
    %c0_i32_0 = arith.constant 0 : i32
    %c0_i32_1 = arith.constant 0 : i32
    return %arg0, %c0_i32, %c0_i32_0 : i32, i32, i32
  }
  func.func @transform_4(%arg0: i32) -> (i32, i32, i32) {
    %c0_i32 = arith.constant 0 : i32
    %c0_i32_0 = arith.constant 0 : i32
    %c0_i32_1 = arith.constant 0 : i32
    return %arg0, %c0_i32, %c0_i32_0 : i32, i32, i32
  }
  func.func @transform_5(%arg0: i32) -> (i32, i32) {
    %c0_i32 = arith.constant 0 : i32
    %c0_i32_0 = arith.constant 0 : i32
    %c0_i32_1 = arith.constant 0 : i32
    return %c0_i32, %c0_i32_0 : i32, i32
  }
  func.func @transform_6(%arg0: i32) -> (i32, i32) {
    %c0_i32 = arith.constant 0 : i32
    %c0_i32_0 = arith.constant 0 : i32
    %c0_i32_1 = arith.constant 0 : i32
    return %c0_i32, %c0_i32_0 : i32, i32
  }
  func.func @transform_7(%arg0: i32) -> (i32, i32) {
    %c0_i32 = arith.constant 0 : i32
    %c0_i32_0 = arith.constant 0 : i32
    %c0_i32_1 = arith.constant 0 : i32
    return %c0_i32, %c0_i32_0 : i32, i32
  }
  func.func @transform_8(%arg0: i32) -> (i32, i32) {
    %c0_i32 = arith.constant 0 : i32
    %c0_i32_0 = arith.constant 0 : i32
    %c0_i32_1 = arith.constant 0 : i32
    return %c0_i32, %c0_i32_0 : i32, i32
  }
  func.func @transform_9(%arg0: i32) -> (i32, i32) {
    %c0_i32 = arith.constant 0 : i32
    %c0_i32_0 = arith.constant 0 : i32
    %c0_i32_1 = arith.constant 0 : i32
    return %c0_i32, %c0_i32_0 : i32, i32
  }
  func.func @transform_10(%arg0: i32) -> (i32, i32) {
    %c0_i32 = arith.constant 0 : i32
    %c0_i32_0 = arith.constant 0 : i32
    %c0_i32_1 = arith.constant 0 : i32
    return %c0_i32, %c0_i32_0 : i32, i32
  }
  func.func @transform_11(%arg0: i32) -> (i32, i32) {
    %c0_i32 = arith.constant 0 : i32
    %c0_i32_0 = arith.constant 0 : i32
    %c0_i32_1 = arith.constant 0 : i32
    return %c0_i32, %c0_i32_0 : i32, i32
  }
  func.func @transform_12(%arg0: i32) -> (i32, i32) {
    %c0_i32 = arith.constant 0 : i32
    %c0_i32_0 = arith.constant 0 : i32
    %c0_i32_1 = arith.constant 0 : i32
    return %c0_i32, %c0_i32_0 : i32, i32
  }
  func.func @transform_13(%arg0: i32) -> (i32, i32) {
    %c0_i32 = arith.constant 0 : i32
    %c0_i32_0 = arith.constant 0 : i32
    %c0_i32_1 = arith.constant 0 : i32
    return %c0_i32, %c0_i32_0 : i32, i32
  }
  func.func @transform_14(%arg0: i32) -> (i32, i32) {
    %c0_i32 = arith.constant 0 : i32
    %c0_i32_0 = arith.constant 0 : i32
    return %arg0, %c0_i32 : i32, i32
  }
}

</mosaic_0001>

<bundles_post_ra>
// kernel: grouped_vector_attention.2
= control target key start
LH: loop header
LB: loop body
LE: loop exit
PB: predicated region body
PF: predicated region fallthrough
CT: control target
= control target key end

     0   :  { %s952_s30 = smov 0   ;;  %s1040_s0 = inlined_call_operand.vmem [shape: f32[32,32], index: 0, kind: input, shape index: {}]   ;;  %s1041_s1 = inlined_call_operand.vmem [shape: f32[32,32], index: 1, kind: input, shape index: {}]   ;;  %s1042_s2 = inlined_call_operand.vmem [shape: f32[1,32], index: 2, kind: input, shape index: {}]   ;;  %s1043_s3 = inlined_call_operand.vmem [shape: f32[32,32], index: 3, kind: input, shape index: {}]   ;;  %s1044_s4 = inlined_call_operand.vmem [shape: f32[1,32], index: 4, kind: input, shape index: {}]   ;;  %s1045_s5 = inlined_call_operand.vmem [shape: f32[32,32], index: 5, kind: input, shape index: {}]   ;;  %s1046_s6 = inlined_call_operand.vmem [shape: f32[1,32], index: 6, kind: input, shape index: {}]   ;;  %s1047_s7 = inlined_call_operand.vmem [shape: f32[32,32], index: 7, kind: output, shape index: {0}]   ;;  %s1048_s8 = inlined_call_operand.vmem [shape: bf16[32,32], index: 8, kind: output, shape index: {1}]   ;;  %s1049_s9 = inlined_call_operand.vmem [shape: bf16[32,32], index: 9, kind: output, shape index: {2}]  }
   0x1 LB: > { %s798_s10 = sadd.s32 4294967295, %s899_s30   ;;  %p802_p0 = scmp.ge.s32.totalorder %s899_s30, 1  ;;  %s899_s30 = sphi %s952_s30, %s20_s30  }
   0x2   : > { %p293_p1 = scmp.lt.s32.totalorder %s899_s30, 3 }
   0x4   : > { %p294_p2 = pnand %p802_p0, %p293_p1 }
   0x5   : > { %s803_s17 = sshll.u32 (!%p294_p2), %s798_s10, 1  ;;  %s820_s22 = sshll.u32 (!%p294_p2), %s798_s10, 4 }
   0x6   : > { %297 = sbr.rel (%p294_p2) target bundleno = 231 (0xe7), region = 48  ;;  %p340_p3 = scmp.lt.s32.totalorder (!%p294_p2), %s803_s17, 3 }
   0xb   : > { %v368_v0 = vld [vmem:[%s1041_s1 + $0x18] sm:$0xff]  ;;  %v367_v1 = vld [vmem:[%s1041_s1 + $0x10] sm:$0xff]  ;;  %v366_v4 = vld [vmem:[%s1041_s1 + $0x8] sm:$0xff]  ;;  %s1051_s17 = smov (!%p340_p3, %s803_s17), 3  ;;  %vm376_vm0 = vcmask 261120   ;;  %v635_v14 = vlaneseq  ;;  %v638_v17 = vstv %s820_s22  ;;  %v901_v29 = vmov 0.0  }
   0xc   : > { %v463_v2 = vld [vmem:[%s1043_s3 + $0x18] sm:$0xff]  ;;  %851 = vmatprep.subr.mxu0 %v368_v0  ;;  %v462_v3 = vld [vmem:[%s1043_s3 + $0x10] sm:$0xff]  ;;  %v461_v5 = vld [vmem:[%s1043_s3 + $0x8] sm:$0xff]  ;;  %s804_s28 = sshll.u32 %s1051_s17, 3  ;;  %s808_s13 = sshll.u32 %s1051_s17, 2  ;;  %vm659_vm3 = vcmask 257024  }
   0xd   : > { %862 = vmatprep.subr.mxu1 %v463_v2  ;;  %852 = vmatpush3.msra.mxu0 %v368_v0  ;;  %v365_v6 = vld [vmem:[%s1041_s1] sm:$0xff]  ;;  %s343_s12 = scalar_lea.vmem %s1040_s0, %s804_s28  ;;  %v551_v8 = vld [vmem:[%s1045_s5 + $0x18] sm:$0xff]  ;;  %v550_v11 = vld [vmem:[%s1045_s5 + $0x10] sm:$0xff]  ;;  %v636_v15 = vshrl.u32 %v635_v14, 7  ;;  %s349_s29 = scalar_lea.vmem %s1047_s7, %s804_s28 }
   0xe   : > { %863 = vmatpush3.msra.mxu1 %v463_v2  ;;  %853 = vmatprep.subr.mxu0 %v367_v1  ;;  %v460_v7 = vld [vmem:[%s1043_s3] sm:$0xff]  ;;  %v364_v10 = vld [vmem:[%s343_s12 + $0x8] sm:$0xff]  ;;  %s355_s15 = scalar_lea.vmem %s1048_s8, %s808_s13  ;;  %s361_s18 = scalar_lea.vmem %s1049_s9, %s808_s13 }
   0xf   : > { %864 = vmatprep.subr.mxu1 %v462_v3  ;;  %854 = vmatpush3.msra.mxu0 %v367_v1  ;;  %v363_v9 = vld [vmem:[%s343_s12] sm:$0xff]  ;;  %v549_v12 = vld [vmem:[%s1045_s5 + $0x8] sm:$0xff]  ;;  %v637_v16 = vadd.s32 8, %v636_v15  ;;  %v639_v21 = vadd.s32 %v638_v17, %v636_v15 }
  0x10   : > { %865 = vmatpush3.msra.mxu1 %v462_v3  ;;  %855 = vmatprep.subr.mxu0 %v366_v4  ;;  %v548_v13 = vld [vmem:[%s1045_s5] sm:$0xff] }
  0x11   : > { %866 = vmatprep.subr.mxu1 %v461_v5  ;;  %856 = vmatpush3.msra.mxu0 %v366_v4  ;;  %v640_v18 = vadd.s32 %v638_v17, %v637_v16  ;;  %v811_v19 = vld [vmem:[%s1042_s2] ss:$0 sm:$0xff]  ;;  %vm641_vm2 = vcmp.lt.s32.totalorder %v639_v21, 16 }
  0x12   : > { %867 = vmatpush3.msra.mxu1 %v461_v5  ;;  %857 = vmatprep.subr.mxu0 %v365_v6  ;;  %v814_v22 = vld [vmem:[%s1044_s4] ss:$0 sm:$0xff]  ;;  %v821_v36 = vsel %vm641_vm2, 1.0, %v901_v29 }
  0x13   : > { %868 = vmatprep.subr.mxu1 %v460_v7  ;;  %858 = vmatpush3.msra.mxu0 %v365_v6  ;;  %vm642_vm1 = vcmp.lt.s32.totalorder %v640_v18, 16  ;;  %v817_v35 = vld [vmem:[%s1046_s6] ss:$0 sm:$0xff] }
  0x14   : > { %859 = vmatprep.mubr.msk.f32.mxu0 %vm376_vm0, %v363_v9  ;;  %873 = vmatprep.subr.mxu0 %v551_v8  ;;  %v822_v30 = vsel %vm642_vm1, 1.0, %v901_v29 }
  0x15   : > { %860 = vmatmul.mubr.msk.f32.vlgmr.msra.gmra.mxu0 %vm376_vm0, %v364_v10  ;;  %869 = vmatpush3.msra.mxu1 %v460_v7 }
  0x16   : > { %874 = vmatpush3.msra.mxu0 %v551_v8  ;;  %870 = vmatprep.mubr.msk.f32.mxu1 %vm376_vm0, %v363_v9 }
  0x17   : > { %875 = vmatprep.subr.mxu0 %v550_v11  ;;  %871 = vmatmul.mubr.msk.f32.vlgmr.msra.gmra.mxu1 %vm376_vm0, %v364_v10 }
  0x18   : > { %876 = vmatpush3.msra.mxu0 %v550_v11  ;;  %881 = vmatprep.mubr.msk.f32.mxu0 %vm376_vm0, %v363_v9 }
  0x19   : > { %877 = vmatprep.subr.mxu0 %v549_v12 }
  0x1a   : > { %878 = vmatpush3.msra.mxu0 %v549_v12 }
  0x1b   : > { %879 = vmatprep.subr.mxu0 %v548_v13 }
  0x1c   : > { %880 = vmatpush3.msra.mxu0 %v548_v13 }
  0x1d   : > { %882 = vmatmul.mubr.msk.f32.vlgmr.msra.gmra.mxu0 %vm376_vm0, %v364_v10 }
  0xd5   : > { %v861_v20 = vpop.f32.mrf.mxu0 }
  0xd6   : > { %v455_v23 = vadd.f32 %v861_v20, %v811_v19 }
  0xd7   : > { %v449_v24 = vpop.f32.mrf.mxu0  ;;  %v872_v26 = vpop.f32.mrf.mxu1 }
  0xd8   : > { %v450_v25 = vadd.f32 %v811_v19, %v449_v24  ;;  %v543_v27 = vadd.f32 %v872_v26, %v814_v22  ;;  %v459_v32 = vmax.f32 %v455_v23, 0.0 }
  0xd9   : > { %v537_v31 = vpop.f32.mrf.mxu1 }
  0xda   : > { %v458_v28 = vmax.f32 %v450_v25, 0.0  ;;  %v547_v33 = vmax.f32 %v543_v27, 0.0  ;;  %v538_v34 = vadd.f32 %v814_v22, %v537_v31  ;;  %648 = vst.msk [vmem:[%s349_s29 + $0x8] sm:$0xff] %vm376_vm0, %v459_v32 }
  0xdc   : > { %647 = vst.msk [vmem:[%s349_s29] sm:$0xff] %vm376_vm0, %v458_v28  ;;  %v650_v37 = vmul.f32 %v822_v30, %v547_v33  ;;  %v546_v38 = vmax.f32 %v538_v34, 0.0 }
  0xdd   : > { %v883_v39 = vpop.f32.mrf.mxu0 }
  0xde   : > { %v631_v40 = vadd.f32 %v883_v39, %v817_v35  ;;  %v649_v41 = vmul.f32 %v821_v36, %v546_v38  ;;  %v830_v43 = vpack.c.bf16 %v650_v37, %v650_v37 }
  0xdf   : > { %v625_v42 = vpop.f32.mrf.mxu0 }
  0xe0   : > { %v626_v44 = vadd.f32 %v817_v35, %v625_v42  ;;  %v829_v45 = vpack.c.bf16 %v649_v41, %v649_v41  ;;  %v663_v46 = vmul.f32 %v822_v30, %v631_v40  ;;  %661 = vst.msk [vmem:[%s355_s15 + $0x4] sm:$0xf] %vm659_vm3, %v830_v43 }
  0xe2   : > { %v662_v47 = vmul.f32 %v821_v36, %v626_v44  ;;  %660 = vst.msk [vmem:[%s355_s15] sm:$0xf] %vm659_vm3, %v829_v45  ;;  %v832_v49 = vpack.c.bf16 %v663_v46, %v663_v46 }
  0xe4   : > { %v831_v48 = vpack.c.bf16 %v662_v47, %v662_v47  ;;  %673 = vst.msk [vmem:[%s361_s18 + $0x4] sm:$0xf] %vm659_vm3, %v832_v49 }
  0xe6   : > { %672 = vst.msk [vmem:[%s361_s18] sm:$0xf] %vm659_vm3, %v831_v48 }
  0xe7 PF: > { %s20_s30 = sadd.s32 1, %s899_s30  }
  0xe8   : > { %p17_p4 = scmp.ge.s32.totalorder %s20_s30, 4  }
  0xea   :  { %19 = sbr.rel (!%p17_p4) target bundleno = 1 (0x1), region = 102 }

// kernel: grouped_vector_attention.3
= control target key start
LH: loop header
LB: loop body
LE: loop exit
PB: predicated region body
PF: predicated region fallthrough
CT: control target
= control target key end

     0   :  { %s3278_s29 = smov 0   ;;  %s3900_s0 = inlined_call_operand.vmem [shape: f32[32,32], index: 0, kind: input, shape index: {}]   ;;  %s3901_s1 = inlined_call_operand.vmem [shape: bf16[32,8,32], index: 1, kind: input, shape index: {}]   ;;  %s3902_s2 = inlined_call_operand.vmem [shape: bf16[32,8,32], index: 2, kind: input, shape index: {}]   ;;  %s3903_s3 = inlined_call_operand.vmem [shape: f32[32,8,3], index: 3, kind: input, shape index: {}]   ;;  %s3904_s4 = inlined_call_operand.vmem [shape: f32[32,8,1], index: 4, kind: input, shape index: {}]   ;;  %s3905_s5 = inlined_call_operand.vmem [shape: f32[3,32], index: 5, kind: input, shape index: {}]   ;;  %s3906_s6 = inlined_call_operand.vmem [shape: f32[1,32], index: 6, kind: input, shape index: {}]   ;;  %s3907_s7 = inlined_call_operand.vmem [shape: f32[32,32], index: 7, kind: input, shape index: {}]   ;;  %s3908_s8 = inlined_call_operand.vmem [shape: f32[1,32], index: 8, kind: input, shape index: {}]   ;;  %s3909_s9 = inlined_call_operand.vmem [shape: f32[32,4], index: 9, kind: input, shape index: {}]   ;;  %s3910_s10 = inlined_call_operand.vmem [shape: f32[1,4], index: 10, kind: input, shape index: {}]   ;;  %s3911_s11 = inlined_call_operand.vmem [shape: f32[4,4], index: 11, kind: input, shape index: {}]   ;;  %s3912_s12 = inlined_call_operand.vmem [shape: f32[1,4], index: 12, kind: input, shape index: {}]   ;;  %s3913_s13 = inlined_call_operand.vmem [shape: f32[4,32], index: 13, kind: input, shape index: {}]   ;;  %s3914_s14 = inlined_call_operand.vmem [shape: f32[32,32], index: 14, kind: output, shape index: {}]  }
   0x1 LB: > { %s2726_s30 = sadd.s32 4294967295, %s3197_s29   ;;  %p2730_p0 = scmp.ge.s32.totalorder %s3197_s29, 1  ;;  %s3197_s29 = sphi %s3278_s29, %s24_s29  }
   0x2   : > { %p457_p1 = scmp.lt.s32.totalorder %s3197_s29, 3 }
   0x4   : > { %p458_p2 = pnand %p2730_p0, %p457_p1 }
   0x5   : > { %s2733_s15 = sshll.u32 (!%p458_p2), %s2726_s30, 4  ;;  %s2731_s28 = sshll.u32 (!%p458_p2), %s2726_s30, 1 }
   0x6   : > { %461 = sbr.rel (%p458_p2) target bundleno = 1164 (0x48c), region = 76  ;;  %p530_p3 = scmp.lt.s32.totalorder (!%p458_p2), %s2733_s15, 31 }
   0x7   : > { %p524_p4 = scmp.lt.s32.totalorder (!%p458_p2), %s2731_s28, 3 }
   0xb   : > { %v3199_v0 = vmov 0   ;;  %s3916_s15 = smov (!%p530_p3, %s2733_s15), 31  ;;  %v3200_v3 = vmov 1   ;;  %v3201_v5 = vmov 2   ;;  %v1000_v14 = vld [vmem:[%s3907_s7 + $0x18] sm:$0xff]  ;;  %v999_v15 = vld [vmem:[%s3907_s7 + $0x10] sm:$0xff]  ;;  %v738_v22 = vlaneseq }
   0xc   : > { %3097 = vset.pattern.permute.xlu1 %v3199_v0  ;;  %3095 = vset.pattern.permute.xlu0 %v3199_v0  ;;  %s2738_s16 = sshll.u32 %s3916_s15, 3  ;;  %v998_v16 = vld [vmem:[%s3907_s7 + $0x8] sm:$0xff]  ;;  %v997_v17 = vld [vmem:[%s3907_s7] sm:$0xff]  ;;  %vm1008_vm0 = vcmask 261120   ;;  %s3918_s28 = smov (!%p524_p4, %s2731_s28), 3  ;;  %vm1707_vm1 = vcmask 1043456  }
   0xd   : > { %s3298_s19 = scalar_lea.vmem %s3903_s3, %s2738_s16  ;;  %2967 = vmatprep.subr.mxu0 %v1000_v14  ;;  %v3358_v23 = vshrl.u32 %v738_v22, 7  ;;  %v657_v25 = vld [vmem:[%s3905_s5] sm:$0x7]  ;;  %s2732_s17 = sshll.u32 %s3918_s28, 3  ;;  %vm1658_vm2 = vcmask 31744   ;;  %vm2597_vm3 = vcmask 1041409  }
   0xe   : > { %v626_v1 = vld [vmem:[%s3298_s19 + $0x8] sm:$0xff]  ;;  %v625_v2 = vld [vmem:[%s3298_s19] sm:$0xff]  ;;  %v628_v4 = vld [vmem:[%s3298_s19 + $0x18] sm:$0xff]  ;;  %2968 = vmatpush3.msra.mxu0 %v1000_v14  ;;  %s3502_s20 = scalar_lea.vmem %s3900_s0, %s2732_s17  ;;  %s2734_s30 = sshll.u32 %s3916_s15, 2  ;;  %vm2599_vm4 = vcmask 1042434   ;;  %vm2601_vm5 = vcmask 1043459  }
   0xf   : > { %665 = vperm.xlu1 %3097, %v626_v1   ;;  %660 = vperm.xlu0 %3095, %v625_v2   ;;  %v630_v6 = vld [vmem:[%s3298_s19 + $0x28] sm:$0xff]  ;;  %v627_v7 = vld [vmem:[%s3298_s19 + $0x10] sm:$0xff]  ;;  %v632_v8 = vld [vmem:[%s3298_s19 + $0x38] sm:$0xff]  ;;  %v3362_v24 = vsub.s32 0, %v3358_v23  ;;  %v824_v28 = vsub.s32 1, %v3358_v23  ;;  %v924_v31 = vsub.s32 2, %v3358_v23  ;;  %s3515_s23 = scalar_lea.vmem %s3901_s1, %s2734_s30  ;;  %s3830_s18 = scalar_lea.vmem %s3902_s2, %s2734_s30 }
  0x10   : > { %v634_v9 = vld [vmem:[%s3298_s19 + $0x48] sm:$0xff]  ;;  %v636_v10 = vld [vmem:[%s3298_s19 + $0x58] sm:$0xff]  ;;  %v629_v12 = vld [vmem:[%s3298_s19 + $0x20] sm:$0xff]  ;;  %2969 = vmatprep.subr.mxu0 %v999_v15  ;;  %vm2603_vm6 = vcmask 1044484   ;;  %vm2605_vm7 = vcmask 1045509   ;;  %vm2607_vm8 = vcmask 1046534  }
  0x11   : > { %v3315_v11 = vld [vmem:[%s3298_s19 + $0x68] sm:$0xff]  ;;  %v3321_v13 = vld [vmem:[%s3298_s19 + $0x78] sm:$0xff]  ;;  %2970 = vmatpush3.msra.mxu0 %v999_v15  ;;  %v631_v18 = vld [vmem:[%s3298_s19 + $0x30] sm:$0xff]  ;;  %v3370_v29 = vrot.slane %v657_v25, %v3362_v24  ;;  %v3374_v32 = vrot.slane %v657_v25, %v824_v28  ;;  %v3379_v37 = vrot.slane %v657_v25, %v924_v31  ;;  %vm2609_vm9 = vcmask 1047559  }
  0x12   : > { %2971 = vmatprep.subr.mxu0 %v998_v16  ;;  %v633_v19 = vld [vmem:[%s3298_s19 + $0x40] sm:$0xff]  ;;  %v635_v20 = vld [vmem:[%s3298_s19 + $0x50] sm:$0xff] }
  0x13   : > { %3098 = vset.pattern.permute.xlu1 %v3200_v3  ;;  %3096 = vset.pattern.permute.xlu0 %v3200_v3  ;;  %v637_v21 = vld [vmem:[%s3298_s19 + $0x60] sm:$0xff]  ;;  %v639_v30 = vld [vmem:[%s3298_s19 + $0x70] sm:$0xff]  ;;  %s3863_s19 = scalar_lea.vmem %s3914_s14, %s2732_s17 }
  0x14   : > { %763 = vperm.xlu1 %3098, %v626_v1   ;;  %759 = vperm.xlu0 %3096, %v625_v2   ;;  %v3386_v42 = vld [vmem:[%s3906_s6] ss:$0 sm:$0xff] }
  0x15   : > { %2972 = vmatpush3.msra.mxu0 %v998_v16 }
  0x16   : > { %2973 = vmatprep.subr.mxu0 %v997_v17 }
  0x17   : > { %2974 = vmatpush3.msra.mxu0 %v997_v17 }
  0x18   : > { %3099 = vset.pattern.permute.xlu1 %v3201_v5  ;;  %3102 = vset.pattern.permute.xlu0 %v3199_v0 }
  0x19   : > { %859 = vperm.xlu1 %3099, %v625_v2   ;;  %675 = vperm.xlu0 %3102, %v628_v4  }
  0x1d   : > { %3100 = vset.pattern.permute.xlu1 %v3199_v0  ;;  %685 = vperm.xlu0 %3102, %v630_v6  }
  0x1e   : > { %670 = vperm.xlu1 %3100, %v627_v7  }
  0x21   : > { %695 = vperm.xlu0 %3102, %v632_v8  }
  0x22   : > { %3101 = vset.pattern.permute.xlu1 %v3200_v3 }
  0x23   : > { %767 = vperm.xlu1 %3101, %v627_v7  }
  0x25   : > { %705 = vperm.xlu0 %3102, %v634_v9  }
  0x27   : > { %771 = vperm.xlu1 %3101, %v628_v4  }
  0x29   : > { %715 = vperm.xlu0 %3102, %v636_v10  }
  0x2b   : > { %3103 = vset.pattern.permute.xlu1 %v3201_v5 }
  0x2c   : > { %867 = vperm.xlu1 %3103, %v627_v7  }
  0x2d   : > { %725 = vperm.xlu0 %3102, %v3315_v11  }
  0x30   : > { %3104 = vset.pattern.permute.xlu1 %v3199_v0 }
  0x31   : > { %680 = vperm.xlu1 %3104, %v629_v12   ;;  %735 = vperm.xlu0 %3102, %v3321_v13  }
  0x35   : > { %3105 = vset.pattern.permute.xlu1 %v3200_v3  ;;  %3121 = vset.pattern.permute.xlu0 %v3201_v5 }
  0x36   : > { %775 = vperm.xlu1 %3105, %v629_v12   ;;  %863 = vperm.xlu0 %3121, %v626_v1  }
  0x3a   : > { %779 = vperm.xlu1 %3105, %v630_v6   ;;  %871 = vperm.xlu0 %3121, %v628_v4  }
  0x3e   : > { %3106 = vset.pattern.permute.xlu1 %v3201_v5  ;;  %879 = vperm.xlu0 %3121, %v630_v6  }
  0x3f   : > { %875 = vperm.xlu1 %3106, %v629_v12  }
  0x42   : > { %887 = vperm.xlu0 %3121, %v632_v8  }
  0x43   : > { %3107 = vset.pattern.permute.xlu1 %v3199_v0 }
  0x44   : > { %690 = vperm.xlu1 %3107, %v631_v18  }
  0x46   : > { %895 = vperm.xlu0 %3121, %v634_v9  }
  0x48   : > { %3108 = vset.pattern.permute.xlu1 %v3200_v3 }
  0x49   : > { %783 = vperm.xlu1 %3108, %v631_v18  }
  0x4a   : > { %903 = vperm.xlu0 %3121, %v636_v10  }
  0x4d   : > { %787 = vperm.xlu1 %3108, %v632_v8  }
  0x4e   : > { %911 = vperm.xlu0 %3121, %v3315_v11  }
  0x51   : > { %3109 = vset.pattern.permute.xlu1 %v3201_v5 }
  0x52   : > { %883 = vperm.xlu1 %3109, %v631_v18   ;;  %919 = vperm.xlu0 %3121, %v3321_v13  }
  0x56   : > { %3110 = vset.pattern.permute.xlu1 %v3199_v0  ;;  %3124 = vset.pattern.permute.xlu0 %v3199_v0 }
  0x57   : > { %700 = vperm.xlu1 %3110, %v633_v19  }
  0x5b   : > { %3111 = vset.pattern.permute.xlu1 %v3200_v3 }
  0x5c   : > { %791 = vperm.xlu1 %3111, %v633_v19  }
  0x60   : > { %795 = vperm.xlu1 %3111, %v634_v9  }
  0x64   : > { %3112 = vset.pattern.permute.xlu1 %v3201_v5 }
  0x65   : > { %891 = vperm.xlu1 %3112, %v633_v19  }
  0x69   : > { %3113 = vset.pattern.permute.xlu1 %v3199_v0 }
  0x6a   : > { %710 = vperm.xlu1 %3113, %v635_v20  }
  0x6e   : > { %3114 = vset.pattern.permute.xlu1 %v3200_v3 }
  0x6f   : > { %799 = vperm.xlu1 %3114, %v635_v20  }
  0x73   : > { %803 = vperm.xlu1 %3114, %v636_v10  }
  0x77   : > { %3115 = vset.pattern.permute.xlu1 %v3201_v5 }
  0x78   : > { %899 = vperm.xlu1 %3115, %v635_v20  }
  0x7c   : > { %3116 = vset.pattern.permute.xlu1 %v3199_v0 }
  0x7d   : > { %720 = vperm.xlu1 %3116, %v637_v21  }
  0x81   : > { %3117 = vset.pattern.permute.xlu1 %v3200_v3 }
  0x82   : > { %807 = vperm.xlu1 %3117, %v637_v21  }
  0x86   : > { %811 = vperm.xlu1 %3117, %v3315_v11  }
  0x8a   : > { %v666_v26 = vpop.permute.xlu1 %665  ;;  %3118 = vset.pattern.permute.xlu1 %v3201_v5  ;;  %v661_v27 = vpop.permute.xlu0 %660 }
  0x8b   : > { %907 = vperm.xlu1 %3118, %v637_v21   ;;  %v742_v33 = vmul.f32 %v3370_v29, %v661_v27  ;;  %v743_v62 = vmul.f32 %v3370_v29, %v666_v26 }
  0x8f   : > { %v764_v34 = vpop.permute.xlu1 %763  ;;  %3119 = vset.pattern.permute.xlu1 %v3199_v0  ;;  %v760_v35 = vpop.permute.xlu0 %759 }
  0x90   : > { %730 = vperm.xlu1 %3119, %v639_v30   ;;  %v826_v36 = vmul.f32 %v3374_v32, %v760_v35  ;;  %v827_v60 = vmul.f32 %v3374_v32, %v764_v34 }
  0x92   : > { %v842_v38 = vadd.f32 %v826_v36, %v742_v33  ;;  %v843_v2 = vadd.f32 %v827_v60, %v743_v62 }
  0x94   : > { %3120 = vset.pattern.permute.xlu1 %v3200_v3  ;;  %v860_v39 = vpop.permute.xlu1 %859  ;;  %v676_v40 = vpop.permute.xlu0 %675 }
  0x95   : > { %v926_v41 = vmul.f32 %v3379_v37, %v860_v39  ;;  %815 = vperm.xlu1 %3120, %v639_v30   ;;  %v745_v3 = vmul.f32 %v3370_v29, %v676_v40 }
  0x97   : > { %v942_v43 = vadd.f32 %v926_v41, %v842_v38 }
  0x98   : > { %v686_v44 = vpop.permute.xlu0 %685 }
  0x99   : > { %819 = vperm.xlu1 %3120, %v3321_v13   ;;  %v671_v45 = vpop.permute.xlu1 %670  ;;  %v965_v46 = vadd.f32 %v3386_v42, %v942_v43  ;;  %v747_v7 = vmul.f32 %v3370_v29, %v686_v44 }
  0x9a   : > { %v744_v58 = vmul.f32 %v3370_v29, %v671_v45 }
  0x9b   : > { %v981_v47 = vmax.f32 %v965_v46, 0.0 }
  0x9c   : > { %v696_v48 = vpop.permute.xlu0 %695 }
  0x9d   : > { %3122 = vset.pattern.permute.xlu1 %v3201_v5  ;;  %2975 = vmatprep.mubr.msk.f32.mxu0 %vm1008_vm0, %v981_v47  ;;  %v749_v43 = vmul.f32 %v3370_v29, %v696_v48 }
  0x9e   : > { %915 = vperm.xlu1 %3122, %v639_v30   ;;  %v768_v49 = vpop.permute.xlu1 %767 }
  0x9f   : > { %v828_v55 = vmul.f32 %v3374_v32, %v768_v49 }
  0xa0   : > { %v3392_v50 = vpop.permute.xlu0 %705 }
  0xa1   : > { %v844_v61 = vadd.f32 %v828_v55, %v744_v58 }
  0xa2   : > { %v772_v51 = vpop.permute.xlu1 %771  ;;  %3123 = vset.pattern.permute.xlu1 %v3199_v0 }
  0xa3   : > { %v829_v4 = vmul.f32 %v3374_v32, %v772_v51 }
  0xa4   : > { %v3395_v52 = vpop.permute.xlu0 %715 }
  0xa5   : > { %v845_v11 = vadd.f32 %v829_v4, %v745_v3 }
  0xa7   : > { %v868_v53 = vpop.permute.xlu1 %867 }
  0xa8   : > { %v3397_v54 = vpop.permute.xlu0 %725  ;;  %v928_v59 = vmul.f32 %v3379_v37, %v868_v53 }
  0xaa   : > { %v944_v63 = vadd.f32 %v928_v59, %v844_v61 }
  0xac   : > { %v681_v56 = vpop.permute.xlu1 %680  ;;  %v3400_v57 = vpop.permute.xlu0 %735  ;;  %v967_v8 = vadd.f32 %v3386_v42, %v944_v63 }
  0xad   : > { %v746_v19 = vmul.f32 %v3370_v29, %v681_v56 }
  0xae   : > { %v983_v18 = vmax.f32 %v967_v8, 0.0 }
  0xb1   : > { %v776_v0 = vpop.permute.xlu1 %775  ;;  %v864_v1 = vpop.permute.xlu0 %863 }
  0xb2   : > { %v927_v5 = vmul.f32 %v3379_v37, %v864_v1  ;;  %v830_v15 = vmul.f32 %v3374_v32, %v776_v0 }
  0xb4   : > { %v943_v6 = vadd.f32 %v927_v5, %v843_v2  ;;  %v846_v27 = vadd.f32 %v830_v15, %v746_v19  ;;  %v751_v2 = vmul.f32 %v3370_v29, %v3392_v50 }
  0xb5   : > { %v780_v9 = vpop.permute.xlu1 %779  ;;  %v872_v10 = vpop.permute.xlu0 %871 }
  0xb6   : > { %v966_v12 = vadd.f32 %v3386_v42, %v943_v6  ;;  %v831_v13 = vmul.f32 %v3374_v32, %v780_v9  ;;  %v929_v14 = vmul.f32 %v3379_v37, %v872_v10 }
  0xb8   : > { %v982_v16 = vmax.f32 %v966_v12, 0.0  ;;  %v945_v17 = vadd.f32 %v929_v14, %v845_v11  ;;  %v847_v21 = vadd.f32 %v831_v13, %v747_v7 }
  0xb9   : > { %v880_v20 = vpop.permute.xlu0 %879 }
  0xba   : > { %v968_v22 = vadd.f32 %v3386_v42, %v945_v17  ;;  %v931_v25 = vmul.f32 %v3379_v37, %v880_v20  ;;  %v876_v26 = vpop.permute.xlu1 %875  ;;  %2976 = vmatmul.mubr.msk.f32.vlgmr.msra.gmra.mxu0 %vm1008_vm0, %v982_v16 }
  0xbb   : > { %v930_v28 = vmul.f32 %v3379_v37, %v876_v26  ;;  %2978 = vmatprep.mubr.msk.f32.mxu0 %vm1008_vm0, %v983_v18 }
  0xbc   : > { %v984_v30 = vmax.f32 %v968_v22, 0.0  ;;  %v947_v31 = vadd.f32 %v931_v25, %v847_v21  ;;  %v753_v21 = vmul.f32 %v3370_v29, %v3395_v52 }
  0xbd   : > { %v946_v33 = vadd.f32 %v930_v28, %v846_v27  ;;  %v888_v41 = vpop.permute.xlu0 %887 }
  0xbe   : > { %v970_v34 = vadd.f32 %v3386_v42, %v947_v31  ;;  %2979 = vmatmul.mubr.msk.f32.gmra.mxu0 %vm1008_vm0, %v984_v30  ;;  %v933_v46 = vmul.f32 %v3379_v37, %v888_v41 }
  0xbf   : > { %v969_v35 = vadd.f32 %v3386_v42, %v946_v33  ;;  %v691_v36 = vpop.permute.xlu1 %690 }
  0xc0   : > { %v986_v39 = vmax.f32 %v970_v34, 0.0  ;;  %v748_v51 = vmul.f32 %v3370_v29, %v691_v36 }
  0xc1   : > { %v985_v38 = vmax.f32 %v969_v35, 0.0  ;;  %v896_v1 = vpop.permute.xlu0 %895 }
  0xc2   : > { %v935_v5 = vmul.f32 %v3379_v37, %v896_v1 }
  0xc3   : > { %2981 = vmatprep.mubr.msk.f32.mxu0 %vm1008_vm0, %v985_v38 }
  0xc4   : > { %v784_v40 = vpop.permute.xlu1 %783  ;;  %2982 = vmatmul.mubr.msk.f32.gmra.mxu0 %vm1008_vm0, %v986_v39  ;;  %v1433_v39 = vld [vmem:[%s3909_s9 + $0x18] sm:$0xff] }
  0xc5   : > { %v832_v47 = vmul.f32 %v3374_v32, %v784_v40  ;;  %v904_v19 = vpop.permute.xlu0 %903  ;;  %2999 = vmatprep.subr.mxu1 %v1433_v39 }
  0xc6   : > { %v937_v25 = vmul.f32 %v3379_v37, %v904_v19  ;;  %3000 = vmatpush3.msra.mxu1 %v1433_v39 }
  0xc7   : > { %v848_v56 = vadd.f32 %v832_v47, %v748_v51 }
  0xc8   : > { %v788_v44 = vpop.permute.xlu1 %787 }
  0xc9   : > { %v833_v45 = vmul.f32 %v3374_v32, %v788_v44 }
  0xcb   : > { %v849_v49 = vadd.f32 %v833_v45, %v749_v43  ;;  %v1432_v43 = vld [vmem:[%s3909_s9 + $0x10] sm:$0xff]  ;;  %v1431_v45 = vld [vmem:[%s3909_s9 + $0x8] sm:$0xff] }
  0xcc   : > { %3001 = vmatprep.subr.mxu1 %v1432_v43 }
  0xcd   : > { %v949_v53 = vadd.f32 %v933_v46, %v849_v49  ;;  %v884_v55 = vpop.permute.xlu1 %883  ;;  %3002 = vmatpush3.msra.mxu1 %v1432_v43  ;;  %v1430_v46 = vld [vmem:[%s3909_s9] sm:$0xff]  ;;  %v755_v49 = vmul.f32 %v3370_v29, %v3397_v54 }
  0xce   : > { %v932_v58 = vmul.f32 %v3379_v37, %v884_v55  ;;  %3003 = vmatprep.subr.mxu1 %v1431_v45 }
  0xcf   : > { %v972_v60 = vadd.f32 %v3386_v42, %v949_v53  ;;  %3004 = vmatpush3.msra.mxu1 %v1431_v45  ;;  %v912_v53 = vpop.permute.xlu0 %911 }
  0xd0   : > { %v948_v59 = vadd.f32 %v932_v58, %v848_v56  ;;  %3005 = vmatprep.subr.mxu1 %v1430_v46  ;;  %v939_v56 = vmul.f32 %v3379_v37, %v912_v53 }
  0xd1   : > { %v988_v63 = vmax.f32 %v972_v60, 0.0  ;;  %3006 = vmatpush3.msra.mxu1 %v1430_v46 }
  0xd2   : > { %v971_v48 = vadd.f32 %v3386_v42, %v948_v59  ;;  %v701_v61 = vpop.permute.xlu1 %700 }
  0xd3   : > { %v750_v8 = vmul.f32 %v3370_v29, %v701_v61 }
  0xd4   : > { %v987_v62 = vmax.f32 %v971_v48, 0.0 }
  0xd6   : > { %2984 = vmatprep.mubr.msk.f32.mxu0 %vm1008_vm0, %v987_v62 }
  0xd7   : > { %v792_v0 = vpop.permute.xlu1 %791  ;;  %2985 = vmatmul.mubr.msk.f32.gmra.mxu0 %vm1008_vm0, %v988_v63 }
  0xd8   : > { %v834_v6 = vmul.f32 %v3374_v32, %v792_v0 }
  0xda   : > { %v850_v11 = vadd.f32 %v834_v6, %v750_v8 }
  0xdb   : > { %v796_v3 = vpop.permute.xlu1 %795 }
  0xdc   : > { %v835_v4 = vmul.f32 %v3374_v32, %v796_v3 }
  0xde   : > { %v851_v7 = vadd.f32 %v835_v4, %v751_v2 }
  0xe0   : > { %v951_v9 = vadd.f32 %v935_v5, %v851_v7  ;;  %v892_v10 = vpop.permute.xlu1 %891  ;;  %v920_v5 = vpop.permute.xlu0 %919  ;;  %v757_v7 = vmul.f32 %v3370_v29, %v3400_v57 }
  0xe1   : > { %v934_v12 = vmul.f32 %v3379_v37, %v892_v10  ;;  %v941_v10 = vmul.f32 %v3379_v37, %v920_v5 }
  0xe2   : > { %v974_v14 = vadd.f32 %v3386_v42, %v951_v9 }
  0xe3   : > { %v950_v13 = vadd.f32 %v934_v12, %v850_v11 }
  0xe4   : > { %v990_v17 = vmax.f32 %v974_v14, 0.0 }
  0xe5   : > { %v973_v50 = vadd.f32 %v3386_v42, %v950_v13  ;;  %v711_v15 = vpop.permute.xlu1 %710 }
  0xe6   : > { %v752_v28 = vmul.f32 %v3370_v29, %v711_v15 }
  0xe7   : > { %v989_v16 = vmax.f32 %v973_v50, 0.0 }
  0xe9   : > { %2987 = vmatprep.mubr.msk.f32.mxu0 %vm1008_vm0, %v989_v16 }
  0xea   : > { %v800_v18 = vpop.permute.xlu1 %799  ;;  %2988 = vmatmul.mubr.msk.f32.gmra.mxu0 %vm1008_vm0, %v990_v17 }
  0xeb   : > { %v836_v26 = vmul.f32 %v3374_v32, %v800_v18 }
  0xed   : > { %v852_v33 = vadd.f32 %v836_v26, %v752_v28 }
  0xee   : > { %v804_v20 = vpop.permute.xlu1 %803 }
  0xef   : > { %v837_v22 = vmul.f32 %v3374_v32, %v804_v20  ;;  %v559_v20 = vld [vmem:[%s3502_s20] sm:$0xff] }
  0xf1   : > { %v853_v27 = vadd.f32 %v837_v22, %v753_v21 }
  0xf3   : > { %v953_v30 = vadd.f32 %v937_v25, %v853_v27  ;;  %v900_v31 = vpop.permute.xlu1 %899  ;;  %v1204_v25 = vcombine.high %v559_v20, %v559_v20 }
  0xf4   : > { %v936_v34 = vmul.f32 %v3379_v37, %v900_v31 }
  0xf5   : > { %v976_v36 = vadd.f32 %v3386_v42, %v953_v30 }
  0xf6   : > { %v952_v35 = vadd.f32 %v936_v34, %v852_v33 }
  0xf7   : > { %v992_v41 = vmax.f32 %v976_v36, 0.0 }
  0xf8   : > { %v975_v38 = vadd.f32 %v3386_v42, %v952_v35  ;;  %v721_v52 = vpop.permute.xlu1 %720 }
  0xf9   : > { %v754_v59 = vmul.f32 %v3370_v29, %v721_v52  ;;  %v2879_v52 = vld [vmem:[%s3515_s23 + $0x8] sm:$0xff]  }
  0xfa   : > { %v991_v40 = vmax.f32 %v975_v38, 0.0  ;;  %v3526_v38 = vld [vmem:[%s3908_s8] ss:$0 sm:$0xff] }
  0xfc   : > { %2990 = vmatprep.mubr.msk.f32.mxu0 %vm1008_vm0, %v991_v40 }
  0xfd   : > { %v808_v44 = vpop.permute.xlu1 %807  ;;  %2991 = vmatmul.mubr.msk.f32.gmra.mxu0 %vm1008_vm0, %v992_v41  ;;  %v2821_v41 = vunpack.c.l.bf16 %v2879_v52 }
  0xfe   : > { %v838_v55 = vmul.f32 %v3374_v32, %v808_v44 }
 0x100   : > { %v854_v61 = vadd.f32 %v838_v55, %v754_v59 }
 0x101   : > { %v812_v47 = vpop.permute.xlu1 %811 }
 0x102   : > { %v839_v51 = vmul.f32 %v3374_v32, %v812_v47 }
 0x104   : > { %v855_v58 = vadd.f32 %v839_v51, %v755_v49  ;;  %v2822_v49 = vunpack.c.h.bf16 %v2879_v52 }
 0x106   : > { %v955_v60 = vadd.f32 %v939_v56, %v855_v58  ;;  %v908_v48 = vpop.permute.xlu1 %907 }
 0x107   : > { %v938_v62 = vmul.f32 %v3379_v37, %v908_v48  ;;  %v2880_v48 = vld [vmem:[%s3515_s23 + $0x10] sm:$0xff]  }
 0x108   : > { %v978_v0 = vadd.f32 %v3386_v42, %v955_v60 }
 0x109   : > { %v954_v63 = vadd.f32 %v938_v62, %v854_v61 }
 0x10a   : > { %v994_v3 = vmax.f32 %v978_v0, 0.0 }
 0x10b   : > { %v977_v54 = vadd.f32 %v3386_v42, %v954_v63  ;;  %v731_v1 = vpop.permute.xlu1 %730 }
 0x10c   : > { %v756_v12 = vmul.f32 %v3370_v29, %v731_v1  ;;  %v3202_v29 = vmov 1966171168   ;;  %v2825_v1 = vunpack.c.l.bf16 %v2880_v48 }
 0x10d   : > { %v993_v2 = vmax.f32 %v977_v54, 0.0 }
 0x10f   : > { %2993 = vmatprep.mubr.msk.f32.mxu0 %vm1008_vm0, %v993_v2 }
 0x110   : > { %v816_v4 = vpop.permute.xlu1 %815  ;;  %2994 = vmatmul.mubr.msk.f32.gmra.mxu0 %vm1008_vm0, %v994_v3  ;;  %v2826_v3 = vunpack.c.h.bf16 %v2880_v48 }
 0x111   : > { %v840_v9 = vmul.f32 %v3374_v32, %v816_v4 }
 0x113   : > { %v856_v50 = vadd.f32 %v840_v9, %v756_v12 }
 0x114   : > { %v820_v6 = vpop.permute.xlu1 %819 }
 0x115   : > { %v841_v8 = vmul.f32 %v3374_v32, %v820_v6  ;;  %v1206_v32 = vunpack.c.l.s4 %v3202_v29 }
 0x117   : > { %v857_v11 = vadd.f32 %v841_v8, %v757_v7 }
 0x119   : > { %v957_v13 = vadd.f32 %v941_v10, %v857_v11  ;;  %v916_v14 = vpop.permute.xlu1 %915 }
 0x11a   : > { %v940_v15 = vmul.f32 %v3379_v37, %v916_v14  ;;  %v1207_v37 = vunpack.c.0.s8 %v1206_v32 }
 0x11b   : > { %v980_v17 = vadd.f32 %v3386_v42, %v957_v13 }
 0x11c   : > { %v956_v16 = vadd.f32 %v940_v15, %v856_v50 }
 0x11d   : > { %v996_v19 = vmax.f32 %v980_v17, 0.0 }
 0x11e   : > { %v979_v57 = vadd.f32 %v3386_v42, %v956_v16  ;;  %v3505_v42 = vsub.s32 %v1207_v37, %v3358_v23  ;;  %v2816_v23 = vld [vmem:[%s3515_s23] sm:$0xff]   ;;  %v2881_v16 = vld [vmem:[%s3515_s23 + $0x18] sm:$0xff]  }
 0x11f   : > { %v2817_v31 = vunpack.c.l.bf16 %v2816_v23  ;;  %v2818_v34 = vunpack.c.h.bf16 %v2816_v23  ;;  %v2829_v17 = vunpack.c.l.bf16 %v2881_v16 }
 0x120   : > { %v995_v18 = vmax.f32 %v979_v57, 0.0  ;;  %v1211_v21 = vrot.slane %v559_v20, %v3505_v42  ;;  %v1218_v28 = vrot.slane %v1204_v25, %v3505_v42 }
 0x122   : > { %2996 = vmatprep.mubr.msk.f32.mxu0 %vm1008_vm0, %v995_v18  ;;  %v1219_v22 = vcombine.high %v1211_v21, %v1211_v21  ;;  %v1227_v26 = vrot.slane %v1211_v21, %v3505_v42  ;;  %v1220_v40 = vcombine.high %v1218_v28, %v1218_v28  ;;  %v1234_v55 = vrot.slane %v1218_v28, %v3505_v42 }
 0x123   : > { %2997 = vmatmul.mubr.msk.f32.gmra.mxu0 %vm1008_vm0, %v996_v19  ;;  %v2830_v18 = vunpack.c.h.bf16 %v2881_v16 }
 0x124   : > { %v1241_v27 = vrot.slane %v1219_v22, %v3505_v42  ;;  %v1249_v30 = vcombine.high %v1227_v26, %v1227_v26  ;;  %v1305_v33 = vrot.slane %v1227_v26, %v3362_v24  ;;  %v1248_v58 = vrot.slane %v1220_v40, %v3505_v42  ;;  %v560_v22 = vld [vmem:[%s3502_s20 + $0x8] sm:$0xff]  ;;  %s3648_s20 = scalar_lea.vmem %s3904_s4, %s2738_s16 }
 0x125   : > { %v1321_v2 = vrot.slane %v1234_v55, %v3362_v24  ;;  %v1250_v50 = vcombine.high %v1234_v55, %v1234_v55 }
 0x126   : > { %v1309_v35 = vrot.slane %v1241_v27, %v3362_v24  ;;  %v1251_v36 = vcombine.high %v1241_v27, %v1241_v27  ;;  %v1313_v43 = vrot.slane %v1249_v30, %v3362_v24  ;;  %v1382_v44 = vsub.f32 %v2817_v31, %v1305_v33  ;;  %v2882_v33 = vld [vmem:[%s3515_s23 + $0x20] sm:$0xff]  }
 0x127   : > { %v1325_v4 = vrot.slane %v1248_v58, %v3362_v24  ;;  %v1386_v8 = vsub.f32 %v2825_v1, %v1321_v2  ;;  %v1252_v15 = vcombine.high %v1248_v58, %v1248_v58  ;;  %v1329_v57 = vrot.slane %v1250_v50, %v3362_v24 }
 0x128   : > { %v1383_v46 = vsub.f32 %v2818_v34, %v1309_v35  ;;  %v1317_v51 = vrot.slane %v1251_v36, %v3362_v24  ;;  %v1384_v59 = vsub.f32 %v2821_v41, %v1313_v43  ;;  %v1260_v27 = vrot.slane %v560_v22, %v3505_v42 }
 0x129   : > { %v1387_v10 = vsub.f32 %v2826_v3, %v1325_v4  ;;  %v1333_v19 = vrot.slane %v1252_v15, %v3362_v24  ;;  %v1388_v32 = vsub.f32 %v2829_v17, %v1329_v57  ;;  %v2833_v34 = vunpack.c.l.bf16 %v2882_v33 }
 0x12a   : > { %v1385_v63 = vsub.f32 %v2822_v49, %v1317_v51  ;;  %v1268_v28 = vcombine.high %v1260_v27, %v1260_v27  ;;  %v1276_v30 = vrot.slane %v1260_v27, %v3505_v42  ;;  %v2834_v36 = vunpack.c.h.bf16 %v2882_v33  ;;  %v2885_v27 = vld [vmem:[%s3515_s23 + $0x38] sm:$0xff]  }
 0x12b   : > { %v1389_v20 = vsub.f32 %v2830_v18, %v1333_v19 }
 0x12c   : > { %v1290_v31 = vrot.slane %v1268_v28, %v3505_v42  ;;  %v1337_v35 = vrot.slane %v1276_v30, %v3362_v24  ;;  %v1298_v51 = vcombine.high %v1276_v30, %v1276_v30  ;;  %v2846_v30 = vunpack.c.h.bf16 %v2885_v27 }
 0x12e   : > { %v1341_v52 = vrot.slane %v1290_v31, %v3362_v24  ;;  %v1390_v40 = vsub.f32 %v2833_v34, %v1337_v35  ;;  %v1300_v55 = vcombine.high %v1290_v31, %v1290_v31 }
 0x130   : > { %v1391_v43 = vsub.f32 %v2834_v36, %v1341_v52  ;;  %v1349_v48 = vrot.slane %v1300_v55, %v3362_v24  ;;  %v645_v55 = vld [vmem:[%s3648_s20 + $0x20] sm:$0xff] }
 0x17a   : > { %v2977_v39 = vpop.f32.mrf.mxu0 }
 0x17b   : > { %v3531_v45 = vadd.f32 %v2977_v39, %v3526_v38 }
 0x17c   : > { %v1123_v47 = vpop.f32.mrf.mxu0 }
 0x17d   : > { %v3535_v53 = vadd.f32 %v3526_v38, %v1123_v47  ;;  %v1399_v61 = vadd.f32 %v1383_v46, %v3531_v45 }
 0x17e   : > { %v2980_v56 = vpop.f32.mrf.mxu0 }
 0x17f   : > { %v1398_v60 = vadd.f32 %v1382_v44, %v3535_v53  ;;  %v3543_v62 = vadd.f32 %v2980_v56, %v3526_v38  ;;  %v2883_v56 = vld [vmem:[%s3515_s23 + $0x28] sm:$0xff]  }
 0x180   : > { %v1133_v0 = vpop.f32.mrf.mxu0  ;;  %v2837_v58 = vunpack.c.l.bf16 %v2883_v56 }
 0x181   : > { %v3546_v54 = vadd.f32 %v3526_v38, %v1133_v0  ;;  %3007 = vmatprep.mubr.msk.f32.mxu1 %vm1008_vm0, %v1398_v60  ;;  %v1401_v6 = vadd.f32 %v1385_v63, %v3543_v62  ;;  %v2838_v60 = vunpack.c.h.bf16 %v2883_v56  ;;  %v1253_v0 = vcombine.high %v560_v22, %v560_v22  ;;  %v650_v56 = vld [vmem:[%s3648_s20 + $0x48] sm:$0xff] }
 0x182   : > { %3008 = vmatmul.mubr.msk.f32.vlgmr.msra.gmra.mxu1 %vm1008_vm0, %v1399_v61 }
 0x183   : > { %v1400_v5 = vadd.f32 %v1384_v59, %v3546_v54  ;;  %v1345_v59 = vrot.slane %v1298_v51, %v3362_v24  ;;  %v1393_v2 = vsub.f32 %v2838_v60, %v1349_v48  ;;  %v648_v51 = vld [vmem:[%s3648_s20 + $0x38] sm:$0xff]  ;;  %v647_v60 = vld [vmem:[%s3648_s20 + $0x30] sm:$0xff] }
 0x184   : > { %v2983_v7 = vpop.f32.mrf.mxu0 }
 0x185   : > { %3010 = vmatprep.mubr.msk.f32.mxu1 %vm1008_vm0, %v1400_v5  ;;  %v3556_v9 = vadd.f32 %v2983_v7, %v3526_v38  ;;  %v1392_v63 = vsub.f32 %v2837_v58, %v1345_v59  ;;  %v3661_v58 = vld [vmem:[%s3910_s10] ss:$0 sm:$0xff] }
 0x186   : > { %v1143_v11 = vpop.f32.mrf.mxu0  ;;  %3011 = vmatmul.mubr.msk.f32.gmra.mxu1 %vm1008_vm0, %v1401_v6  ;;  %v1267_v6 = vrot.slane %v1253_v0, %v3505_v42 }
 0x187   : > { %v3560_v12 = vadd.f32 %v3526_v38, %v1143_v11  ;;  %v1403_v14 = vadd.f32 %v1387_v10, %v3556_v9  ;;  %v1650_v10 = vld [vmem:[%s3911_s11] sm:$0xf] }
 0x188   : > { %3031 = vmatprep.subr.msk.mxu0 %vm1707_vm1, %v1650_v10  ;;  %v1283_v11 = vrot.slane %v1267_v6, %v3505_v42 }
 0x189   : > { %v1402_v13 = vadd.f32 %v1386_v8, %v3560_v12  ;;  %v1269_v8 = vcombine.high %v1267_v6, %v1267_v6  ;;  %3032 = vmatpush3.msk.msra.mxu0 %vm1707_vm1, %v1650_v10 }
 0x18a   : > { %v1353_v15 = vrot.slane %v1283_v11, %v3362_v24  ;;  %v1299_v22 = vcombine.high %v1283_v11, %v1283_v11 }
 0x18b   : > { %3013 = vmatprep.mubr.msk.f32.mxu1 %vm1008_vm0, %v1402_v13  ;;  %v1297_v13 = vrot.slane %v1269_v8, %v3505_v42 }
 0x18c   : > { %3014 = vmatmul.mubr.msk.f32.gmra.mxu1 %vm1008_vm0, %v1403_v14  ;;  %v2884_v14 = vld [vmem:[%s3515_s23 + $0x30] sm:$0xff]   ;;  %v1361_v28 = vrot.slane %v1299_v22, %v3362_v24 }
 0x18d   : > { %v2841_v50 = vunpack.c.l.bf16 %v2884_v14  ;;  %v2842_v16 = vunpack.c.h.bf16 %v2884_v14  ;;  %v1357_v17 = vrot.slane %v1297_v13, %v3362_v24 }
 0x18f   : > { %v1394_v18 = vsub.f32 %v2841_v50, %v1353_v15 }
 0x197   : > { %v2986_v29 = vpop.f32.mrf.mxu0 }
 0x198   : > { %v3570_v37 = vadd.f32 %v2986_v29, %v3526_v38  ;;  %v1395_v29 = vsub.f32 %v2842_v16, %v1357_v17 }
 0x199   : > { %v1153_v21 = vpop.f32.mrf.mxu0 }
 0x19a   : > { %v3574_v25 = vadd.f32 %v3526_v38, %v1153_v21  ;;  %v1405_v23 = vadd.f32 %v1389_v20, %v3570_v37 }
 0x19c   : > { %v1404_v26 = vadd.f32 %v1388_v32, %v3574_v25 }
 0x19e   : > { %3016 = vmatprep.mubr.msk.f32.mxu1 %vm1008_vm0, %v1404_v26  ;;  %v1301_v26 = vcombine.high %v1297_v13, %v1297_v13 }
 0x19f   : > { %3017 = vmatmul.mubr.msk.f32.gmra.mxu1 %vm1008_vm0, %v1405_v23  ;;  %v2845_v23 = vunpack.c.l.bf16 %v2885_v27 }
 0x1a0   : > { %v1365_v31 = vrot.slane %v1301_v26, %v3362_v24  ;;  %v641_v24 = vld [vmem:[%s3648_s20] sm:$0xff] }
 0x1a1   : > { %v1396_v34 = vsub.f32 %v2845_v23, %v1361_v28  ;;  %2162 = vperm.xlu1 %3123, %v641_v24   ;;  %v652_v24 = vld [vmem:[%s3648_s20 + $0x58] sm:$0xff] }
 0x1a2   : > { %v1397_v36 = vsub.f32 %v2846_v30, %v1365_v31 }
 0x1aa   : > { %v2989_v39 = vpop.f32.mrf.mxu0 }
 0x1ab   : > { %v3587_v41 = vadd.f32 %v2989_v39, %v3526_v38 }
 0x1ac   : > { %v1163_v44 = vpop.f32.mrf.mxu0 }
 0x1ad   : > { %v3590_v46 = vadd.f32 %v3526_v38, %v1163_v44  ;;  %v1407_v49 = vadd.f32 %v1391_v43, %v3587_v41  ;;  %v642_v44 = vld [vmem:[%s3648_s20 + $0x8] sm:$0xff] }
 0x1ae   : > { %2167 = vperm.xlu1 %3123, %v642_v44  }
 0x1af   : > { %v1406_v47 = vadd.f32 %v1390_v40, %v3590_v46 }
 0x1b1   : > { %3019 = vmatprep.mubr.msk.f32.mxu1 %vm1008_vm0, %v1406_v47  ;;  %v646_v47 = vld [vmem:[%s3648_s20 + $0x28] sm:$0xff] }
 0x1b2   : > { %3020 = vmatmul.mubr.msk.f32.gmra.mxu1 %vm1008_vm0, %v1407_v49  ;;  %v644_v49 = vld [vmem:[%s3648_s20 + $0x18] sm:$0xff] }
 0x1b3   : > { %2177 = vperm.xlu1 %3123, %v644_v49  }
 0x1b7   : > { %2182 = vperm.xlu1 %3123, %v645_v55  }
 0x1bb   : > { %2192 = vperm.xlu1 %3123, %v647_v60  }
 0x1bd   : > { %v2992_v61 = vpop.f32.mrf.mxu0 }
 0x1be   : > { %v3600_v1 = vadd.f32 %v2992_v61, %v3526_v38 }
 0x1bf   : > { %v1173_v3 = vpop.f32.mrf.mxu0 }
 0x1c0   : > { %v3603_v4 = vadd.f32 %v3526_v38, %v1173_v3  ;;  %v1409_v7 = vadd.f32 %v1393_v2, %v3600_v1  ;;  %v649_v2 = vld [vmem:[%s3648_s20 + $0x40] sm:$0xff] }
 0x1c1   : > { %2202 = vperm.xlu1 %3123, %v649_v2  }
 0x1c2   : > { %v1408_v5 = vadd.f32 %v1392_v63, %v3603_v4 }
 0x1c4   : > { %3022 = vmatprep.mubr.msk.f32.mxu1 %vm1008_vm0, %v1408_v5 }
 0x1c5   : > { %3023 = vmatmul.mubr.msk.f32.gmra.mxu1 %vm1008_vm0, %v1409_v7 }
 0x1d0   : > { %v2995_v57 = vpop.f32.mrf.mxu0 }
 0x1d1   : > { %v3621_v19 = vadd.f32 %v2995_v57, %v3526_v38 }
 0x1d2   : > { %v1183_v32 = vpop.f32.mrf.mxu0 }
 0x1d3   : > { %v3624_v20 = vadd.f32 %v3526_v38, %v1183_v32  ;;  %v1411_v21 = vadd.f32 %v1395_v29, %v3621_v19 }
 0x1d5   : > { %v1410_v42 = vadd.f32 %v1394_v18, %v3624_v20 }
 0x1d7   : > { %3025 = vmatprep.mubr.msk.f32.mxu1 %vm1008_vm0, %v1410_v42 }
 0x1d8   : > { %3026 = vmatmul.mubr.msk.f32.gmra.mxu1 %vm1008_vm0, %v1411_v21 }
 0x1e3   : > { %v2998_v33 = vpop.f32.mrf.mxu0 }
 0x1e4   : > { %v3634_v35 = vadd.f32 %v2998_v33, %v3526_v38 }
 0x1e5   : > { %v1193_v52 = vpop.f32.mrf.mxu0 }
 0x1e6   : > { %v3637_v39 = vadd.f32 %v3526_v38, %v1193_v52  ;;  %v1413_v43 = vadd.f32 %v1397_v36, %v3634_v35  ;;  %v643_v38 = vld [vmem:[%s3648_s20 + $0x10] sm:$0xff] }
 0x1e7   : > { %2172 = vperm.xlu0 %3124, %v643_v38   ;;  %v653_v38 = vld [vmem:[%s3648_s20 + $0x60] sm:$0xff] }
 0x1e8   : > { %v1412_v40 = vadd.f32 %v1396_v34, %v3637_v39 }
 0x1ea   : > { %3028 = vmatprep.mubr.msk.f32.mxu1 %vm1008_vm0, %v1412_v40 }
 0x1eb   : > { %3029 = vmatmul.mubr.msk.f32.gmra.mxu1 %vm1008_vm0, %v1413_v43  ;;  %2187 = vperm.xlu0 %3124, %v646_v47   ;;  %v651_v43 = vld [vmem:[%s3648_s20 + $0x50] sm:$0xff] }
 0x1ec   : > { %2212 = vperm.xlu1 %3123, %v651_v43   ;;  %v655_v47 = vld [vmem:[%s3648_s20 + $0x70] sm:$0xff] }
 0x1ef   : > { %2197 = vperm.xlu0 %3124, %v648_v51  }
 0x1f0   : > { %2222 = vperm.xlu1 %3123, %v653_v38  }
 0x1f3   : > { %2207 = vperm.xlu0 %3124, %v650_v56   ;;  %v654_v56 = vld [vmem:[%s3648_s20 + $0x68] sm:$0xff] }
 0x1f4   : > { %2232 = vperm.xlu1 %3123, %v655_v47  }
 0x1f7   : > { %2217 = vperm.xlu0 %3124, %v652_v24  }
 0x1fb   : > { %2227 = vperm.xlu0 %3124, %v654_v56  }
 0x242   : > { %v3009_v59 = vpop.f32.mrf.mxu1 }
 0x243   : > { %v1561_v48 = vadd.f32 %v3009_v59, %v3661_v58 }
 0x244   : > { %v1555_v61 = vpop.f32.mrf.mxu1 }
 0x245   : > { %v1556_v63 = vadd.f32 %v3661_v58, %v1555_v61  ;;  %v1635_v5 = vmax.f32 %v1561_v48, 0.0  ;;  %v656_v48 = vld [vmem:[%s3648_s20 + $0x78] sm:$0xff] }
 0x246   : > { %v3012_v0 = vpop.f32.mrf.mxu1  ;;  %2237 = vperm.xlu0 %3124, %v656_v48  }
 0x247   : > { %v1634_v3 = vmax.f32 %v1556_v63, 0.0  ;;  %v1571_v6 = vadd.f32 %v3012_v0, %v3661_v58 }
 0x248   : > { %v1565_v7 = vpop.f32.mrf.mxu1 }
 0x249   : > { %v1566_v8 = vadd.f32 %v3661_v58, %v1565_v7  ;;  %3033 = vmatprep.mubr.msk.f32.mxu0 %vm1658_vm2, %v1634_v3  ;;  %v1637_v11 = vmax.f32 %v1571_v6, 0.0  ;;  %v2256_v6 = vld [vmem:[%s3913_s13] sm:$0xf] }
 0x24a   : > { %3034 = vmatmul.mubr.msk.f32.vlgmr.msra.gmra.mxu0 %vm1658_vm2, %v1635_v5  ;;  %3057 = vmatprep.subr.msk.mxu1 %vm1707_vm1, %v2256_v6  ;;  %v3711_v7 = vld [vmem:[%s3912_s12] ss:$0 sm:$0xff] }
 0x24b   : > { %v1636_v10 = vmax.f32 %v1566_v8, 0.0  ;;  %3058 = vmatpush3.msk.msra.mxu1 %vm1707_vm1, %v2256_v6 }
 0x24c   : > { %v3015_v13 = vpop.f32.mrf.mxu1 }
 0x24d   : > { %3036 = vmatprep.mubr.msk.f32.mxu0 %vm1658_vm2, %v1636_v10  ;;  %v1581_v14 = vadd.f32 %v3015_v13, %v3661_v58 }
 0x24e   : > { %v1575_v50 = vpop.f32.mrf.mxu1  ;;  %3037 = vmatmul.mubr.msk.f32.gmra.mxu0 %vm1658_vm2, %v1637_v11 }
 0x24f   : > { %v1576_v15 = vadd.f32 %v3661_v58, %v1575_v50  ;;  %v1639_v17 = vmax.f32 %v1581_v14, 0.0 }
 0x251   : > { %v1638_v16 = vmax.f32 %v1576_v15, 0.0 }
 0x253   : > { %3039 = vmatprep.mubr.msk.f32.mxu0 %vm1658_vm2, %v1638_v16 }
 0x254   : > { %3040 = vmatmul.mubr.msk.f32.gmra.mxu0 %vm1658_vm2, %v1639_v17 }
 0x25f   : > { %v3018_v57 = vpop.f32.mrf.mxu1 }
 0x260   : > { %v1591_v18 = vadd.f32 %v3018_v57, %v3661_v58 }
 0x261   : > { %v1585_v29 = vpop.f32.mrf.mxu1 }
 0x262   : > { %v1586_v32 = vadd.f32 %v3661_v58, %v1585_v29  ;;  %v1641_v21 = vmax.f32 %v1591_v18, 0.0 }
 0x264   : > { %v1640_v42 = vmax.f32 %v1586_v32, 0.0 }
 0x266   : > { %3042 = vmatprep.mubr.msk.f32.mxu0 %vm1658_vm2, %v1640_v42 }
 0x267   : > { %3043 = vmatmul.mubr.msk.f32.gmra.mxu0 %vm1658_vm2, %v1641_v21 }
 0x272   : > { %v3021_v22 = vpop.f32.mrf.mxu1 }
 0x273   : > { %v1601_v26 = vadd.f32 %v3021_v22, %v3661_v58 }
 0x274   : > { %v1595_v27 = vpop.f32.mrf.mxu1 }
 0x275   : > { %v1596_v23 = vadd.f32 %v3661_v58, %v1595_v27  ;;  %v1643_v30 = vmax.f32 %v1601_v26, 0.0 }
 0x277   : > { %v1642_v28 = vmax.f32 %v1596_v23, 0.0 }
 0x279   : > { %3045 = vmatprep.mubr.msk.f32.mxu0 %vm1658_vm2, %v1642_v28 }
 0x27a   : > { %3046 = vmatmul.mubr.msk.f32.gmra.mxu0 %vm1658_vm2, %v1643_v30 }
 0x285   : > { %v3024_v31 = vpop.f32.mrf.mxu1 }
 0x286   : > { %v1611_v33 = vadd.f32 %v3024_v31, %v3661_v58 }
 0x287   : > { %v1605_v34 = vpop.f32.mrf.mxu1 }
 0x288   : > { %v1606_v36 = vadd.f32 %v3661_v58, %v1605_v34  ;;  %v1645_v40 = vmax.f32 %v1611_v33, 0.0 }
 0x28a   : > { %v1644_v52 = vmax.f32 %v1606_v36, 0.0 }
 0x28c   : > { %3048 = vmatprep.mubr.msk.f32.mxu0 %vm1658_vm2, %v1644_v52 }
 0x28d   : > { %3049 = vmatmul.mubr.msk.f32.gmra.mxu0 %vm1658_vm2, %v1645_v40 }
 0x298   : > { %v3027_v44 = vpop.f32.mrf.mxu1 }
 0x299   : > { %v1621_v49 = vadd.f32 %v3027_v44, %v3661_v58 }
 0x29a   : > { %v1615_v51 = vpop.f32.mrf.mxu1 }
 0x29b   : > { %v1616_v55 = vadd.f32 %v3661_v58, %v1615_v51  ;;  %v1647_v60 = vmax.f32 %v1621_v49, 0.0 }
 0x29d   : > { %v1646_v59 = vmax.f32 %v1616_v55, 0.0 }
 0x29f   : > { %3051 = vmatprep.mubr.msk.f32.mxu0 %vm1658_vm2, %v1646_v59 }
 0x2a0   : > { %3052 = vmatmul.mubr.msk.f32.gmra.mxu0 %vm1658_vm2, %v1647_v60 }
 0x2ab   : > { %v3030_v61 = vpop.f32.mrf.mxu1 }
 0x2ac   : > { %v1631_v63 = vadd.f32 %v3030_v61, %v3661_v58 }
 0x2ad   : > { %v1625_v0 = vpop.f32.mrf.mxu1 }
 0x2ae   : > { %v1626_v2 = vadd.f32 %v3661_v58, %v1625_v0  ;;  %v1649_v5 = vmax.f32 %v1631_v63, 0.0 }
 0x2b0   : > { %v1648_v3 = vmax.f32 %v1626_v2, 0.0 }
 0x2b2   : > { %3054 = vmatprep.mubr.msk.f32.mxu0 %vm1658_vm2, %v1648_v3 }
 0x2b3   : > { %3055 = vmatmul.mubr.msk.f32.gmra.mxu0 %vm1658_vm2, %v1649_v5 }
 0x30a   : > { %v3035_v58 = vpop.f32.mrf.mxu0 }
 0x30b   : > { %v1783_v8 = vadd.f32 %v3035_v58, %v3711_v7 }
 0x30c   : > { %v1777_v10 = vpop.f32.mrf.mxu0 }
 0x30d   : > { %v1863_v11 = vsel %vm1658_vm2, %v1783_v8, -inf  ;;  %v1778_v13 = vadd.f32 %v3711_v7, %v1777_v10 }
 0x30e   : > { %v1864_v14 = vrot.slane %v1863_v11, 4  ;;  %v3038_v50 = vpop.f32.mrf.mxu0 }
 0x30f   : > { %v1856_v15 = vsel %vm1658_vm2, %v1778_v13, -inf  ;;  %v1793_v16 = vadd.f32 %v3038_v50, %v3711_v7 }
 0x310   : > { %v1865_v17 = vmax.f32 %v1863_v11, %v1864_v14  ;;  %v1857_v57 = vrot.slane %v1856_v15, 4  ;;  %v1787_v18 = vpop.f32.mrf.mxu0 }
 0x311   : > { %v1877_v29 = vsel %vm1658_vm2, %v1793_v16, -inf  ;;  %v1788_v32 = vadd.f32 %v3711_v7, %v1787_v18 }
 0x312   : > { %v1866_v42 = vrot.slane %v1865_v17, 2  ;;  %v1858_v21 = vmax.f32 %v1856_v15, %v1857_v57  ;;  %v1878_v22 = vrot.slane %v1877_v29, 4 }
 0x313   : > { %v1870_v26 = vsel %vm1658_vm2, %v1788_v32, -inf }
 0x314   : > { %v1867_v27 = vmax.f32 %v1865_v17, %v1866_v42  ;;  %v1859_v23 = vrot.slane %v1858_v21, 2  ;;  %v1879_v28 = vmax.f32 %v1877_v29, %v1878_v22  ;;  %v1871_v30 = vrot.slane %v1870_v26, 4  ;;  %v3041_v31 = vpop.f32.mrf.mxu0 }
 0x315   : > { %v1803_v33 = vadd.f32 %v3041_v31, %v3711_v7 }
 0x316   : > { %v1868_v34 = vrot.slane %v1867_v27, 1  ;;  %v1860_v36 = vmax.f32 %v1858_v21, %v1859_v23  ;;  %v1880_v52 = vrot.slane %v1879_v28, 2  ;;  %v1872_v40 = vmax.f32 %v1870_v26, %v1871_v30  ;;  %v1797_v43 = vpop.f32.mrf.mxu0 }
 0x317   : > { %v1891_v24 = vsel %vm1658_vm2, %v1803_v33, -inf  ;;  %v1798_v38 = vadd.f32 %v3711_v7, %v1797_v43 }
 0x318   : > { %v1869_v44 = vmax.f32 %v1867_v27, %v1868_v34  ;;  %v1861_v47 = vrot.slane %v1860_v36, 1  ;;  %v1881_v49 = vmax.f32 %v1879_v28, %v1880_v52  ;;  %v1873_v51 = vrot.slane %v1872_v40, 2 }
 0x319   : > { %v1892_v55 = vrot.slane %v1891_v24, 4  ;;  %v1884_v56 = vsel %vm1658_vm2, %v1798_v38, -inf }
 0x31a   : > { %v1969_v59 = vsub.f32 %v1783_v8, %v1869_v44  ;;  %v1862_v60 = vmax.f32 %v1860_v36, %v1861_v47  ;;  %v1882_v48 = vrot.slane %v1881_v49, 1  ;;  %v1874_v61 = vmax.f32 %v1872_v40, %v1873_v51 }
 0x31b   : > { %v1893_v63 = vmax.f32 %v1891_v24, %v1892_v55  ;;  %v1885_v0 = vrot.slane %v1884_v56, 4 }
 0x31c   : > { %v1986_v2 = vmul.f32 1.442695, %v1969_v59  ;;  %v1968_v3 = vsub.f32 %v1778_v13, %v1862_v60  ;;  %v1883_v5 = vmax.f32 %v1881_v49, %v1882_v48  ;;  %v1875_v6 = vrot.slane %v1874_v61, 1 }
 0x31d   : > { %v1894_v58 = vrot.slane %v1893_v63, 2  ;;  %v1886_v10 = vmax.f32 %v1884_v56, %v1885_v0 }
 0x31e   : > { %3127 = vpow2.f32 %v1986_v2  ;;  %v1984_v11 = vmul.f32 1.442695, %v1968_v3  ;;  %v1971_v14 = vsub.f32 %v1793_v16, %v1883_v5  ;;  %v1876_v50 = vmax.f32 %v1874_v61, %v1875_v6 }
 0x31f   : > { %v1895_v15 = vmax.f32 %v1893_v63, %v1894_v58  ;;  %v1887_v17 = vrot.slane %v1886_v10, 2 }
 0x320   : > { %3129 = vpow2.f32 %v1984_v11  ;;  %v1990_v57 = vmul.f32 1.442695, %v1971_v14  ;;  %v1970_v8 = vsub.f32 %v1788_v32, %v1876_v50 }
 0x321   : > { %v1896_v18 = vrot.slane %v1895_v15, 1  ;;  %v1888_v29 = vmax.f32 %v1886_v10, %v1887_v17 }
 0x322   : > { %3131 = vpow2.f32 %v1990_v57  ;;  %v1988_v42 = vmul.f32 1.442695, %v1970_v8 }
 0x323   : > { %v1897_v21 = vmax.f32 %v1895_v15, %v1896_v18  ;;  %v1889_v22 = vrot.slane %v1888_v29, 1 }
 0x324   : > { %3133 = vpow2.f32 %v1988_v42 }
 0x325   : > { %v1973_v13 = vsub.f32 %v1803_v33, %v1897_v21  ;;  %v1890_v26 = vmax.f32 %v1888_v29, %v1889_v22 }
 0x327   : > { %v1994_v27 = vmul.f32 1.442695, %v1973_v13  ;;  %v1972_v23 = vsub.f32 %v1798_v38, %v1890_v26  ;;  %v3044_v28 = vpop.f32.mrf.mxu0 }
 0x328   : > { %v1813_v16 = vadd.f32 %v3044_v28, %v3711_v7 }
 0x329   : > { %3135 = vpow2.f32 %v1994_v27  ;;  %v1992_v30 = vmul.f32 1.442695, %v1972_v23  ;;  %v1807_v31 = vpop.f32.mrf.mxu0 }
 0x32a   : > { %v1905_v34 = vsel %vm1658_vm2, %v1813_v16, -inf  ;;  %v1808_v32 = vadd.f32 %v3711_v7, %v1807_v31 }
 0x32b   : > { %v3728_v36 = vpop.eup %3127  ;;  %3137 = vpow2.f32 %v1992_v30  ;;  %v1906_v52 = vrot.slane %v1905_v34, 4 }
 0x32c   : > { %v2023_v33 = vsel %vm1658_vm2, %v3728_v36, 0.0  ;;  %v1898_v40 = vsel %vm1658_vm2, %v1808_v32, -inf }
 0x32d   : > { %v3733_v43 = vpop.eup %3129  ;;  %v2024_v24 = vrot.slane %v2023_v33, 4  ;;  %v1907_v38 = vmax.f32 %v1905_v34, %v1906_v52  ;;  %v1899_v44 = vrot.slane %v1898_v40, 4 }
 0x32e   : > { %v2016_v47 = vsel %vm1658_vm2, %v3733_v43, 0.0 }
 0x32f   : > { %v3737_v49 = vpop.eup %3131  ;;  %v2025_v51 = vadd.f32 %v2024_v24, %v2023_v33  ;;  %v2017_v55 = vrot.slane %v2016_v47, 4  ;;  %v1908_v56 = vrot.slane %v1907_v38, 2  ;;  %v1900_v59 = vmax.f32 %v1898_v40, %v1899_v44 }
 0x330   : > { %v2037_v60 = vsel %vm1658_vm2, %v3737_v49, 0.0 }
 0x331   : > { %v3741_v48 = vpop.eup %3133  ;;  %v2026_v61 = vrot.slane %v2025_v51, 2  ;;  %v2018_v63 = vadd.f32 %v2017_v55, %v2016_v47  ;;  %v2038_v0 = vrot.slane %v2037_v60, 4  ;;  %v1909_v2 = vmax.f32 %v1907_v38, %v1908_v56 }
 0x332   : > { %v2030_v3 = vsel %vm1658_vm2, %v3741_v48, 0.0  ;;  %v1901_v5 = vrot.slane %v1900_v59, 2 }
 0x333   : > { %v2019_v6 = vrot.slane %v2018_v63, 2  ;;  %v2039_v58 = vadd.f32 %v2038_v0, %v2037_v60  ;;  %v2031_v10 = vrot.slane %v2030_v3, 4  ;;  %v1910_v11 = vrot.slane %v1909_v2, 1 }
 0x334   : > { %v1902_v14 = vmax.f32 %v1900_v59, %v1901_v5  ;;  %v2027_v50 = vadd.f32 %v2026_v61, %v2025_v51 }
 0x335   : > { %v2040_v15 = vrot.slane %v2039_v58, 2  ;;  %v2032_v17 = vadd.f32 %v2031_v10, %v2030_v3  ;;  %v1911_v57 = vmax.f32 %v1909_v2, %v1910_v11  ;;  %v2020_v8 = vadd.f32 %v2019_v6, %v2018_v63 }
 0x336   : > { %v3745_v18 = vpop.eup %3135  ;;  %v1903_v29 = vrot.slane %v1902_v14, 1  ;;  %v2028_v42 = vrot.slane %v2027_v50, 1 }
 0x337   : > { %v2033_v21 = vrot.slane %v2032_v17, 2  ;;  %v2051_v22 = vsel %vm1658_vm2, %v3745_v18, 0.0  ;;  %v1975_v13 = vsub.f32 %v1813_v16, %v1911_v57  ;;  %v2021_v26 = vrot.slane %v2020_v8, 1 }
 0x338   : > { %v3749_v27 = vpop.eup %3137  ;;  %v2052_v23 = vrot.slane %v2051_v22, 4  ;;  %v1904_v28 = vmax.f32 %v1902_v14, %v1903_v29  ;;  %v2029_v30 = vadd.f32 %v2028_v42, %v2027_v50  ;;  %v2041_v31 = vadd.f32 %v2040_v15, %v2039_v58 }
 0x339   : > { %v2044_v34 = vsel %vm1658_vm2, %v3749_v27, 0.0  ;;  %v1998_v52 = vmul.f32 1.442695, %v1975_v13  ;;  %v2022_v33 = vadd.f32 %v2021_v26, %v2020_v8  ;;  %v2034_v40 = vadd.f32 %v2033_v21, %v2032_v17  ;;  %v2163_v8 = vpop.permute.xlu1 %2162 }
 0x33a   : > { %v2053_v24 = vadd.f32 %v2052_v23, %v2051_v22  ;;  %v2045_v38 = vrot.slane %v2044_v34, 4  ;;  %v1974_v44 = vsub.f32 %v1808_v32, %v1904_v28  ;;  %v3047_v47 = vpop.f32.mrf.mxu0  ;;  %3139 = vrcp.f32 %v2029_v30 }
 0x33b   : > { %3141 = vpow2.f32 %v1998_v52  ;;  %v1823_v16 = vadd.f32 %v3047_v47, %v3711_v7  ;;  %v2042_v51 = vrot.slane %v2041_v31, 1  ;;  %v2035_v55 = vrot.slane %v2034_v40, 1 }
 0x33c   : > { %v2054_v56 = vrot.slane %v2053_v24, 2  ;;  %v2046_v59 = vadd.f32 %v2045_v38, %v2044_v34  ;;  %v1996_v60 = vmul.f32 1.442695, %v1974_v44  ;;  %v1817_v61 = vpop.f32.mrf.mxu0  ;;  %3143 = vrcp.f32 %v2022_v33 }
 0x33d   : > { %v1919_v63 = vsel %vm1658_vm2, %v1823_v16, -inf  ;;  %v1818_v0 = vadd.f32 %v3711_v7, %v1817_v61  ;;  %v2043_v2 = vadd.f32 %v2042_v51, %v2041_v31  ;;  %v2036_v3 = vadd.f32 %v2035_v55, %v2034_v40  ;;  %v2168_v33 = vpop.permute.xlu1 %2167 }
 0x33e   : > { %v2047_v5 = vrot.slane %v2046_v59, 2  ;;  %3145 = vpow2.f32 %v1996_v60  ;;  %v1920_v32 = vrot.slane %v1919_v63, 4  ;;  %v2055_v6 = vadd.f32 %v2054_v56, %v2053_v24 }
 0x33f   : > { %v1912_v58 = vsel %vm1658_vm2, %v1818_v0, -inf  ;;  %3147 = vrcp.f32 %v2043_v2 }
 0x340   : > { %v1921_v10 = vmax.f32 %v1919_v63, %v1920_v32  ;;  %v1913_v11 = vrot.slane %v1912_v58, 4  ;;  %3149 = vrcp.f32 %v2036_v3  ;;  %v2056_v14 = vrot.slane %v2055_v6, 1 }
 0x341   : > { %v2048_v50 = vadd.f32 %v2047_v5, %v2046_v59 }
 0x342   : > { %v1922_v15 = vrot.slane %v1921_v10, 2  ;;  %v1914_v17 = vmax.f32 %v1912_v58, %v1913_v11  ;;  %v2057_v57 = vadd.f32 %v2056_v14, %v2055_v6  ;;  %v2173_v58 = vpop.permute.xlu0 %2172  ;;  %v2178_v11 = vpop.permute.xlu1 %2177 }
 0x343   : > { %v2049_v29 = vrot.slane %v2048_v50, 1 }
 0x344   : > { %v1923_v42 = vmax.f32 %v1921_v10, %v1922_v15  ;;  %v1915_v21 = vrot.slane %v1914_v17, 2  ;;  %3151 = vrcp.f32 %v2057_v57 }
 0x345   : > { %v2050_v22 = vadd.f32 %v2049_v29, %v2048_v50 }
 0x346   : > { %v1924_v13 = vrot.slane %v1923_v42, 1  ;;  %v1916_v26 = vmax.f32 %v1914_v17, %v1915_v21 }
 0x347   : > { %v3140_v23 = vpop.eup %3139  ;;  %3153 = vrcp.f32 %v2050_v22 }
 0x348   : > { %v3757_v28 = vpop.eup %3141  ;;  %v1925_v30 = vmax.f32 %v1923_v42, %v1924_v13  ;;  %v1917_v31 = vrot.slane %v1916_v26, 1  ;;  %v2145_v40 = vmul.f32 %v3140_v23, %v3728_v36 }
 0x349   : > { %v3144_v34 = vpop.eup %3143  ;;  %v2065_v52 = vsel %vm1658_vm2, %v3757_v28, 0.0 }
 0x34a   : > { %v2066_v24 = vrot.slane %v2065_v52, 4  ;;  %v1977_v38 = vsub.f32 %v1823_v16, %v1925_v30  ;;  %v1918_v44 = vmax.f32 %v1916_v26, %v1917_v31  ;;  %v2144_v47 = vmul.f32 %v3144_v34, %v3733_v43  ;;  %v2183_v31 = vpop.permute.xlu1 %2182 }
 0x34b   : > { %v3763_v51 = vpop.eup %3145  ;;  %v2241_v5 = vmul.f32 %v2168_v33, %v2145_v40  ;;  %v2188_v40 = vpop.permute.xlu0 %2187 }
 0x34c   : > { %v3148_v55 = vpop.eup %3147  ;;  %v2067_v56 = vadd.f32 %v2066_v24, %v2065_v52  ;;  %v2058_v59 = vsel %vm1658_vm2, %v3763_v51, 0.0  ;;  %v2002_v60 = vmul.f32 1.442695, %v1977_v38  ;;  %v1976_v61 = vsub.f32 %v1818_v0, %v1918_v44 }
 0x34d   : > { %v3150_v63 = vpop.eup %3149  ;;  %v2059_v2 = vrot.slane %v2058_v59, 4  ;;  %v2240_v3 = vmul.f32 %v2163_v8, %v2144_v47  ;;  %v2147_v36 = vmul.f32 %v3148_v55, %v3737_v49  ;;  %v3050_v32 = vpop.f32.mrf.mxu0 }
 0x34e   : > { %v2068_v16 = vrot.slane %v2067_v56, 2  ;;  %3155 = vpow2.f32 %v2002_v60  ;;  %v2000_v6 = vmul.f32 1.442695, %v1976_v61  ;;  %v1833_v43 = vadd.f32 %v3050_v32, %v3711_v7 }
 0x34f   : > { %v2060_v10 = vadd.f32 %v2059_v2, %v2058_v59  ;;  %3059 = vmatprep.mubr.msk.f32.mxu1 %vm1658_vm2, %v2240_v3  ;;  %v2146_v14 = vmul.f32 %v3150_v63, %v3741_v48  ;;  %v1827_v0 = vpop.f32.mrf.mxu0  ;;  %v2243_v42 = vmul.f32 %v2178_v11, %v2147_v36 }
 0x350   : > { %3157 = vpow2.f32 %v2000_v6  ;;  %v1933_v50 = vsel %vm1658_vm2, %v1833_v43, -inf  ;;  %3060 = vmatmul.mubr.msk.f32.vlgmr.msra.gmra.mxu1 %vm1658_vm2, %v2241_v5  ;;  %v1828_v49 = vadd.f32 %v3711_v7, %v1827_v0  ;;  %v2069_v15 = vadd.f32 %v2068_v16, %v2067_v56 }
 0x351   : > { %v3152_v17 = vpop.eup %3151  ;;  %v2061_v57 = vrot.slane %v2060_v10, 2  ;;  %v1934_v8 = vrot.slane %v1933_v50, 4  ;;  %v2242_v29 = vmul.f32 %v2173_v58, %v2146_v14 }
 0x352   : > { %v1926_v21 = vsel %vm1658_vm2, %v1828_v49, -inf  ;;  %v2070_v22 = vrot.slane %v2069_v15, 1  ;;  %v2149_v30 = vmul.f32 %v3152_v17, %v3745_v18 }
 0x353   : > { %v1935_v13 = vmax.f32 %v1933_v50, %v1934_v8  ;;  %v1927_v26 = vrot.slane %v1926_v21, 4  ;;  %3062 = vmatprep.mubr.msk.f32.mxu1 %vm1658_vm2, %v2242_v29  ;;  %v2062_v48 = vadd.f32 %v2061_v57, %v2060_v10 }
 0x354   : > { %v3154_v23 = vpop.eup %3153  ;;  %3063 = vmatmul.mubr.msk.f32.gmra.mxu1 %vm1658_vm2, %v2243_v42  ;;  %v2071_v34 = vadd.f32 %v2070_v22, %v2069_v15  ;;  %v2245_v59 = vmul.f32 %v2188_v40, %v2149_v30 }
 0x355   : > { %v1936_v52 = vrot.slane %v1935_v13, 2  ;;  %v1928_v33 = vmax.f32 %v1926_v21, %v1927_v26  ;;  %v2148_v24 = vmul.f32 %v3154_v23, %v3749_v27  ;;  %v2063_v38 = vrot.slane %v2062_v48, 1 }
 0x356   : > { %3159 = vrcp.f32 %v2071_v34 }
 0x357   : > { %v1937_v44 = vmax.f32 %v1935_v13, %v1936_v52  ;;  %v1929_v47 = vrot.slane %v1928_v33, 2  ;;  %v2244_v55 = vmul.f32 %v2183_v31, %v2148_v24  ;;  %v2064_v56 = vadd.f32 %v2063_v38, %v2062_v48  ;;  %v2193_v31 = vpop.permute.xlu1 %2192  ;;  %v2198_v52 = vpop.permute.xlu0 %2197 }
 0x359   : > { %v1938_v60 = vrot.slane %v1937_v44, 1  ;;  %v1930_v61 = vmax.f32 %v1928_v33, %v1929_v47  ;;  %3065 = vmatprep.mubr.msk.f32.mxu1 %vm1658_vm2, %v2244_v55  ;;  %3161 = vrcp.f32 %v2064_v56 }
 0x35a   : > { %3066 = vmatmul.mubr.msk.f32.gmra.mxu1 %vm1658_vm2, %v2245_v59 }
 0x35b   : > { %v3781_v18 = vpop.eup %3155  ;;  %v1939_v63 = vmax.f32 %v1937_v44, %v1938_v60  ;;  %v1931_v2 = vrot.slane %v1930_v61, 1 }
 0x35c   : > { %v2079_v27 = vsel %vm1658_vm2, %v3781_v18, 0.0 }
 0x35d   : > { %v3785_v3 = vpop.eup %3157  ;;  %v2080_v5 = vrot.slane %v2079_v27, 4  ;;  %v1979_v36 = vsub.f32 %v1833_v43, %v1939_v63  ;;  %v1932_v32 = vmax.f32 %v1930_v61, %v1931_v2 }
 0x35e   : > { %v2072_v16 = vsel %vm1658_vm2, %v3785_v3, 0.0 }
 0x35f   : > { %v2081_v6 = vadd.f32 %v2080_v5, %v2079_v27  ;;  %v2073_v58 = vrot.slane %v2072_v16, 4  ;;  %v2006_v10 = vmul.f32 1.442695, %v1979_v36  ;;  %v1978_v11 = vsub.f32 %v1828_v49, %v1932_v32 }
 0x360   : > { %v3053_v14 = vpop.f32.mrf.mxu0 }
 0x361   : > { %v2082_v0 = vrot.slane %v2081_v6, 2  ;;  %v2074_v50 = vadd.f32 %v2073_v58, %v2072_v16  ;;  %3163 = vpow2.f32 %v2006_v10  ;;  %v2004_v15 = vmul.f32 1.442695, %v1978_v11 }
 0x362   : > { %v1843_v17 = vadd.f32 %v3053_v14, %v3711_v7  ;;  %v1837_v57 = vpop.f32.mrf.mxu0 }
 0x363   : > { %v3160_v8 = vpop.eup %3159  ;;  %v2075_v29 = vrot.slane %v2074_v50, 2  ;;  %3165 = vpow2.f32 %v2004_v15  ;;  %v1838_v43 = vadd.f32 %v3711_v7, %v1837_v57  ;;  %v2083_v42 = vadd.f32 %v2082_v0, %v2081_v6 }
 0x364   : > { %v1947_v21 = vsel %vm1658_vm2, %v1843_v17, -inf  ;;  %v2151_v30 = vmul.f32 %v3160_v8, %v3757_v28 }
 0x365   : > { %v1948_v22 = vrot.slane %v1947_v21, 4  ;;  %v1940_v13 = vsel %vm1658_vm2, %v1838_v43, -inf  ;;  %v2084_v49 = vrot.slane %v2083_v42, 1  ;;  %v2076_v26 = vadd.f32 %v2075_v29, %v2074_v50 }
 0x366   : > { %v3162_v48 = vpop.eup %3161  ;;  %v1941_v23 = vrot.slane %v1940_v13, 4  ;;  %v2247_v59 = vmul.f32 %v2198_v52, %v2151_v30  ;;  %v2208_v52 = vpop.permute.xlu0 %2207 }
 0x367   : > { %v1949_v34 = vmax.f32 %v1947_v21, %v1948_v22  ;;  %v2150_v33 = vmul.f32 %v3162_v48, %v3763_v51  ;;  %v2085_v40 = vadd.f32 %v2084_v49, %v2083_v42  ;;  %v2077_v24 = vrot.slane %v2076_v26, 1 }
 0x368   : > { %v1942_v38 = vmax.f32 %v1940_v13, %v1941_v23  ;;  %v2203_v23 = vpop.permute.xlu1 %2202 }
 0x369   : > { %v1950_v44 = vrot.slane %v1949_v34, 2  ;;  %v2246_v47 = vmul.f32 %v2193_v31, %v2150_v33  ;;  %3167 = vrcp.f32 %v2085_v40  ;;  %v2078_v55 = vadd.f32 %v2077_v24, %v2076_v26 }
 0x36a   : > { %v1943_v56 = vrot.slane %v1942_v38, 2 }
 0x36b   : > { %v1951_v60 = vmax.f32 %v1949_v34, %v1950_v44  ;;  %3068 = vmatprep.mubr.msk.f32.mxu1 %vm1658_vm2, %v2246_v47  ;;  %3169 = vrcp.f32 %v2078_v55 }
 0x36c   : > { %v1944_v61 = vmax.f32 %v1942_v38, %v1943_v56  ;;  %3069 = vmatmul.mubr.msk.f32.gmra.mxu1 %vm1658_vm2, %v2247_v59 }
 0x36d   : > { %v1952_v28 = vrot.slane %v1951_v60, 1 }
 0x36e   : > { %v3797_v63 = vpop.eup %3163  ;;  %v1945_v51 = vrot.slane %v1944_v61, 1 }
 0x36f   : > { %v2093_v2 = vsel %vm1658_vm2, %v3797_v63, 0.0  ;;  %v1953_v27 = vmax.f32 %v1951_v60, %v1952_v28 }
 0x370   : > { %v3801_v5 = vpop.eup %3165  ;;  %v2094_v36 = vrot.slane %v2093_v2, 4  ;;  %v1946_v32 = vmax.f32 %v1944_v61, %v1945_v51 }
 0x371   : > { %v2086_v16 = vsel %vm1658_vm2, %v3801_v5, 0.0  ;;  %v1981_v6 = vsub.f32 %v1843_v17, %v1953_v27 }
 0x372   : > { %v2095_v58 = vadd.f32 %v2094_v36, %v2093_v2  ;;  %v2087_v10 = vrot.slane %v2086_v16, 4  ;;  %v1980_v11 = vsub.f32 %v1838_v43, %v1946_v32 }
 0x373   : > { %v2010_v14 = vmul.f32 1.442695, %v1981_v6  ;;  %v3056_v0 = vpop.f32.mrf.mxu0 }
 0x374   : > { %v2096_v50 = vrot.slane %v2095_v58, 2  ;;  %v2088_v15 = vadd.f32 %v2087_v10, %v2086_v16  ;;  %v2008_v57 = vmul.f32 1.442695, %v1980_v11  ;;  %v1853_v8 = vadd.f32 %v3056_v0, %v3711_v7 }
 0x375   : > { %3171 = vpow2.f32 %v2010_v14  ;;  %v1847_v29 = vpop.f32.mrf.mxu0 }
 0x376   : > { %v3168_v42 = vpop.eup %3167  ;;  %v2089_v21 = vrot.slane %v2088_v15, 2  ;;  %3173 = vpow2.f32 %v2008_v57  ;;  %v1961_v22 = vsel %vm1658_vm2, %v1853_v8, -inf  ;;  %v1848_v13 = vadd.f32 %v3711_v7, %v1847_v29 }
 0x377   : > { %v1962_v17 = vrot.slane %v1961_v22, 4  ;;  %v2097_v49 = vadd.f32 %v2096_v50, %v2095_v58  ;;  %v2153_v48 = vmul.f32 %v3168_v42, %v3781_v18 }
 0x378   : > { %v3170_v26 = vpop.eup %3169  ;;  %v1954_v43 = vsel %vm1658_vm2, %v1848_v13, -inf  ;;  %v2090_v30 = vadd.f32 %v2089_v21, %v2088_v15 }
 0x379   : > { %v1963_v31 = vmax.f32 %v1961_v22, %v1962_v17  ;;  %v1955_v34 = vrot.slane %v1954_v43, 4  ;;  %v2152_v33 = vmul.f32 %v3170_v26, %v3785_v3  ;;  %v2098_v24 = vrot.slane %v2097_v49, 1  ;;  %v2218_v17 = vpop.permute.xlu0 %2217  ;;  %v2213_v26 = vpop.permute.xlu1 %2212 }
 0x37a   : > { %v2091_v40 = vrot.slane %v2090_v30, 1  ;;  %v2249_v7 = vmul.f32 %v2208_v52, %v2153_v48 }
 0x37b   : > { %v1964_v38 = vrot.slane %v1963_v31, 2  ;;  %v1956_v44 = vmax.f32 %v1954_v43, %v1955_v34  ;;  %v2248_v47 = vmul.f32 %v2203_v23, %v2152_v33  ;;  %v2099_v56 = vadd.f32 %v2098_v24, %v2097_v49 }
 0x37c   : > { %v2092_v55 = vadd.f32 %v2091_v40, %v2090_v30 }
 0x37d   : > { %v1965_v59 = vmax.f32 %v1963_v31, %v1964_v38  ;;  %v1957_v60 = vrot.slane %v1956_v44, 2  ;;  %3071 = vmatprep.mubr.msk.f32.mxu1 %vm1658_vm2, %v2248_v47 }
 0x37e   : > { %3072 = vmatmul.mubr.msk.f32.gmra.mxu1 %vm1658_vm2, %v2249_v7  ;;  %3175 = vrcp.f32 %v2092_v55 }
 0x37f   : > { %v1966_v18 = vrot.slane %v1965_v59, 1  ;;  %v1958_v61 = vmax.f32 %v1956_v44, %v1957_v60  ;;  %3177 = vrcp.f32 %v2099_v56 }
 0x381   : > { %v1967_v28 = vmax.f32 %v1965_v59, %v1966_v18  ;;  %v1959_v3 = vrot.slane %v1958_v61, 1 }
 0x382   : > { %v3172_v51 = vpop.eup %3171 }
 0x383   : > { %v3174_v2 = vpop.eup %3173  ;;  %v2107_v27 = vsel %vm1658_vm2, %v3172_v51, 0.0  ;;  %v1983_v36 = vsub.f32 %v1853_v8, %v1967_v28  ;;  %v1960_v32 = vmax.f32 %v1958_v61, %v1959_v3  ;;  %v2223_v28 = vpop.permute.xlu1 %2222 }
 0x384   : > { %v2108_v16 = vrot.slane %v2107_v27, 4  ;;  %v2100_v6 = vsel %vm1658_vm2, %v3174_v2, 0.0 }
 0x385   : > { %v2101_v58 = vrot.slane %v2100_v6, 4  ;;  %v2014_v10 = vmul.f32 1.442695, %v1983_v36  ;;  %v1982_v11 = vsub.f32 %v1848_v13, %v1960_v32  ;;  %v2228_v32 = vpop.permute.xlu0 %2227 }
 0x386   : > { %v2109_v14 = vadd.f32 %v2108_v16, %v2107_v27 }
 0x387   : > { %v2102_v0 = vadd.f32 %v2101_v58, %v2100_v6  ;;  %3179 = vpow2.f32 %v2014_v10  ;;  %v2012_v50 = vmul.f32 1.442695, %v1982_v11 }
 0x388   : > { %v2110_v15 = vrot.slane %v2109_v14, 2 }
 0x389   : > { %v2103_v57 = vrot.slane %v2102_v0, 2  ;;  %3181 = vpow2.f32 %v2012_v50 }
 0x38a   : > { %v2111_v29 = vadd.f32 %v2110_v15, %v2109_v14  ;;  %v2233_v14 = vpop.permute.xlu1 %2232  ;;  %v2848_v15 = vld [vmem:[%s3830_s18] sm:$0xff]  }
 0x38b   : > { %v3176_v42 = vpop.eup %3175  ;;  %v2104_v21 = vadd.f32 %v2103_v57, %v2102_v0  ;;  %v2238_v0 = vpop.permute.xlu0 %2237  ;;  %v2850_v57 = vunpack.c.h.bf16 %v2848_v15 }
 0x38c   : > { %v3178_v22 = vpop.eup %3177  ;;  %v2154_v8 = vmul.f32 %v3176_v42, %v3801_v5  ;;  %v2112_v49 = vrot.slane %v2111_v29, 1  ;;  %v2849_v42 = vunpack.c.l.bf16 %v2848_v15 }
 0x38d   : > { %v2155_v43 = vmul.f32 %v3178_v22, %v3797_v63  ;;  %v2105_v48 = vrot.slane %v2104_v21, 1 }
 0x38e   : > { %v2250_v13 = vmul.f32 %v2213_v26, %v2154_v8  ;;  %v2113_v23 = vadd.f32 %v2112_v49, %v2111_v29  ;;  %v2886_v29 = vld [vmem:[%s3830_s18 + $0x8] sm:$0xff]   ;;  %v1414_v49 = vadd.f32 %v2849_v42, %v3535_v53 }
 0x38f   : > { %v2251_v30 = vmul.f32 %v2218_v17, %v2155_v43  ;;  %v2106_v31 = vadd.f32 %v2105_v48, %v2104_v21  ;;  %v1415_v21 = vadd.f32 %v2850_v57, %v3531_v45  ;;  %v2854_v22 = vunpack.c.h.bf16 %v2886_v29  ;;  %v2887_v48 = vld [vmem:[%s3830_s18 + $0x10] sm:$0xff]  }
 0x390   : > { %3074 = vmatprep.mubr.msk.f32.mxu1 %vm1658_vm2, %v2250_v13  ;;  %3183 = vrcp.f32 %v2113_v23  ;;  %v2853_v26 = vunpack.c.l.bf16 %v2886_v29 }
 0x391   : > { %3185 = vrcp.f32 %v2106_v31  ;;  %3075 = vmatmul.mubr.msk.f32.gmra.mxu1 %vm1658_vm2, %v2251_v30  ;;  %v1417_v30 = vadd.f32 %v2854_v22, %v3543_v62 }
 0x392   : > { %v1416_v45 = vadd.f32 %v2853_v26, %v3546_v54  ;;  %v2888_v26 = vld [vmem:[%s3830_s18 + $0x18] sm:$0xff]  }
 0x394   : > { %v3180_v34 = vpop.eup %3179 }
 0x395   : > { %v2121_v52 = vsel %vm1658_vm2, %v3180_v34, 0.0 }
 0x396   : > { %v3182_v5 = vpop.eup %3181  ;;  %v2122_v33 = vrot.slane %v2121_v52, 4 }
 0x397   : > { %v2114_v40 = vsel %vm1658_vm2, %v3182_v5, 0.0 }
 0x398   : > { %v2123_v24 = vadd.f32 %v2122_v33, %v2121_v52  ;;  %v2115_v63 = vrot.slane %v2114_v40, 4  ;;  %v2858_v33 = vunpack.c.h.bf16 %v2887_v48 }
 0x39a   : > { %v2124_v38 = vrot.slane %v2123_v24, 2  ;;  %v2116_v44 = vadd.f32 %v2115_v63, %v2114_v40 }
 0x39c   : > { %v2117_v47 = vrot.slane %v2116_v44, 2  ;;  %v2125_v7 = vadd.f32 %v2124_v38, %v2123_v24 }
 0x39d   : > { %v3184_v55 = vpop.eup %3183 }
 0x39e   : > { %v3186_v56 = vpop.eup %3185  ;;  %v2118_v59 = vadd.f32 %v2117_v47, %v2116_v44  ;;  %v2157_v60 = vmul.f32 %v3184_v55, %v3172_v51  ;;  %v2126_v18 = vrot.slane %v2125_v7, 1  ;;  %v2857_v44 = vunpack.c.l.bf16 %v2887_v48 }
 0x39f   : > { %v2156_v61 = vmul.f32 %v3186_v56, %v3174_v2  ;;  %v1419_v56 = vadd.f32 %v2858_v33, %v3556_v9 }
 0x3a0   : > { %v2119_v3 = vrot.slane %v2118_v59, 1  ;;  %v2127_v27 = vadd.f32 %v2126_v18, %v2125_v7  ;;  %v2253_v6 = vmul.f32 %v2228_v32, %v2157_v60 }
 0x3a1   : > { %v2252_v36 = vmul.f32 %v2223_v28, %v2156_v61 }
 0x3a2   : > { %v2120_v16 = vadd.f32 %v2119_v3, %v2118_v59  ;;  %3187 = vrcp.f32 %v2127_v27  ;;  %v1418_v3 = vadd.f32 %v2857_v44, %v3560_v12 }
 0x3a3   : > { %3077 = vmatprep.mubr.msk.f32.mxu1 %vm1658_vm2, %v2252_v36 }
 0x3a4   : > { %3189 = vrcp.f32 %v2120_v16  ;;  %3078 = vmatmul.mubr.msk.f32.gmra.mxu1 %vm1658_vm2, %v2253_v6 }
 0x3af   : > { %v3188_v58 = vpop.eup %3187 }
 0x3b0   : > { %v2159_v11 = vmul.f32 %v3188_v58, %v3180_v34 }
 0x3b1   : > { %v3190_v10 = vpop.eup %3189 }
 0x3b2   : > { %v2158_v51 = vmul.f32 %v3190_v10, %v3182_v5  ;;  %v2255_v50 = vmul.f32 %v2238_v0, %v2159_v11 }
 0x3b4   : > { %v2254_v2 = vmul.f32 %v2233_v14, %v2158_v51 }
 0x3b6   : > { %3080 = vmatprep.mubr.msk.f32.mxu1 %vm1658_vm2, %v2254_v2 }
 0x3b7   : > { %3081 = vmatmul.mubr.msk.f32.gmra.mxu1 %vm1658_vm2, %v2255_v50 }
 0x410   : > { %v3061_v8 = vpop.f32.mrf.mxu1 }
 0x411   : > { %v2454_v17 = vmul.f32 %v3061_v8, %v1415_v21 }
 0x412   : > { %v2374_v43 = vpop.f32.mrf.mxu1 }
 0x413   : > { %v2476_v13 = vsel %vm1008_vm0, %v2454_v17, 0.0  ;;  %v2453_v23 = vmul.f32 %v2374_v43, %v1414_v49 }
 0x414   : > { %v2477_v31 = vrot.slane %v2476_v13, 4  ;;  %v3064_v34 = vpop.f32.mrf.mxu1 }
 0x415   : > { %v2469_v52 = vsel %vm1008_vm0, %v2453_v23, 0.0  ;;  %v2456_v5 = vmul.f32 %v3064_v34, %v1417_v30  ;;  %v2862_v34 = vunpack.c.h.bf16 %v2888_v26 }
 0x416   : > { %v2478_v40 = vadd.f32 %v2477_v31, %v2476_v13  ;;  %v2470_v24 = vrot.slane %v2469_v52, 4  ;;  %v2384_v63 = vpop.f32.mrf.mxu1 }
 0x417   : > { %v2490_v53 = vsel %vm1008_vm0, %v2456_v5, 0.0  ;;  %v2455_v38 = vmul.f32 %v2384_v63, %v1416_v45  ;;  %v2861_v5 = vunpack.c.l.bf16 %v2888_v26 }
 0x418   : > { %v2479_v47 = vrot.slane %v2478_v40, 2  ;;  %v2471_v7 = vadd.f32 %v2470_v24, %v2469_v52  ;;  %v2491_v55 = vrot.slane %v2490_v53, 4 }
 0x419   : > { %v2483_v62 = vsel %vm1008_vm0, %v2455_v38, 0.0  ;;  %v1420_v38 = vadd.f32 %v2861_v5, %v3574_v25 }
 0x41a   : > { %v2480_v59 = vadd.f32 %v2479_v47, %v2478_v40  ;;  %v2472_v60 = vrot.slane %v2471_v7, 2  ;;  %v2492_v18 = vadd.f32 %v2491_v55, %v2490_v53  ;;  %v2484_v61 = vrot.slane %v2483_v62, 4  ;;  %v3067_v54 = vpop.f32.mrf.mxu1 }
 0x41b   : > { %v2458_v28 = vmul.f32 %v3067_v54, %v1419_v56  ;;  %v1421_v40 = vadd.f32 %v2862_v34, %v3570_v37 }
 0x41c   : > { %v2481_v27 = vrot.slane %v2480_v59, 1  ;;  %v2473_v36 = vadd.f32 %v2472_v60, %v2471_v7  ;;  %v2493_v32 = vrot.slane %v2492_v18, 2  ;;  %v2485_v16 = vadd.f32 %v2484_v61, %v2483_v62  ;;  %v2394_v6 = vpop.f32.mrf.mxu1 }
 0x41d   : > { %v2504_v58 = vsel %vm1008_vm0, %v2458_v28, 0.0  ;;  %v2457_v10 = vmul.f32 %v2394_v6, %v1418_v3  ;;  %v2889_v28 = vld [vmem:[%s3830_s18 + $0x20] sm:$0xff]  }
 0x41e   : > { %v2474_v11 = vrot.slane %v2473_v36, 1  ;;  %v2494_v51 = vadd.f32 %v2493_v32, %v2492_v18  ;;  %v2486_v14 = vrot.slane %v2485_v16, 2  ;;  %v2505_v9 = vrot.slane %v2504_v58, 4 }
 0x41f   : > { %v2497_v2 = vsel %vm1008_vm0, %v2457_v10, 0.0  ;;  %v2482_v0 = vadd.f32 %v2481_v27, %v2480_v59  ;;  %v2866_v25 = vunpack.c.h.bf16 %v2889_v28  ;;  %v2865_v32 = vunpack.c.l.bf16 %v2889_v28 }
 0x420   : > { %v2475_v50 = vadd.f32 %v2474_v11, %v2473_v36  ;;  %v2487_v15 = vadd.f32 %v2486_v14, %v2485_v16  ;;  %v2498_v12 = vrot.slane %v2497_v2, 4  ;;  %v2495_v57 = vrot.slane %v2494_v51, 1 }
 0x421   : > { %v2506_v29 = vadd.f32 %v2505_v9, %v2504_v58  ;;  %v1423_v58 = vadd.f32 %v2866_v25, %v3587_v41  ;;  %v1422_v9 = vadd.f32 %v2865_v32, %v3590_v46 }
 0x422   : > { %v2598_v42 = vsel %vm2597_vm3, %v2482_v0, %v2475_v50  ;;  %v2488_v21 = vrot.slane %v2487_v15, 1  ;;  %v2499_v22 = vadd.f32 %v2498_v12, %v2497_v2  ;;  %v2496_v43 = vadd.f32 %v2495_v57, %v2494_v51 }
 0x423   : > { %v2507_v8 = vrot.slane %v2506_v29, 2 }
 0x424   : > { %v2489_v17 = vadd.f32 %v2488_v21, %v2487_v15  ;;  %v2500_v49 = vrot.slane %v2499_v22, 2 }
 0x425   : > { %v2508_v48 = vadd.f32 %v2507_v8, %v2506_v29  ;;  %v2890_v8 = vld [vmem:[%s3830_s18 + $0x28] sm:$0xff]  }
 0x426   : > { %v2600_v13 = vsel %vm2599_vm4, %v2489_v17, %v2598_v42  ;;  %v2501_v23 = vadd.f32 %v2500_v49, %v2499_v22  ;;  %v2870_v46 = vunpack.c.h.bf16 %v2890_v8 }
 0x427   : > { %v2509_v30 = vrot.slane %v2508_v48, 1  ;;  %v2602_v31 = vsel %vm2601_vm5, %v2496_v43, %v2600_v13  ;;  %v2869_v13 = vunpack.c.l.bf16 %v2890_v8 }
 0x428   : > { %v2502_v52 = vrot.slane %v2501_v23, 1 }
 0x429   : > { %v2510_v33 = vadd.f32 %v2509_v30, %v2508_v48  ;;  %v1425_v30 = vadd.f32 %v2870_v46, %v3600_v1 }
 0x42a   : > { %v2503_v45 = vadd.f32 %v2502_v52, %v2501_v23  ;;  %v1424_v52 = vadd.f32 %v2869_v13, %v3603_v4 }
 0x42c   : > { %v2604_v24 = vsel %vm2603_vm6, %v2503_v45, %v2602_v31  ;;  %v3070_v63 = vpop.f32.mrf.mxu1 }
 0x42d   : > { %v2460_v53 = vmul.f32 %v3070_v63, %v1421_v40  ;;  %v2606_v44 = vsel %vm2605_vm7, %v2510_v33, %v2604_v24 }
 0x42e   : > { %v2404_v47 = vpop.f32.mrf.mxu1 }
 0x42f   : > { %v2518_v7 = vsel %vm1008_vm0, %v2460_v53, 0.0  ;;  %v2459_v55 = vmul.f32 %v2404_v47, %v1420_v38 }
 0x430   : > { %v2519_v62 = vrot.slane %v2518_v7, 4 }
 0x431   : > { %v2511_v56 = vsel %vm1008_vm0, %v2459_v55, 0.0  ;;  %v2891_v55 = vld [vmem:[%s3830_s18 + $0x30] sm:$0xff]  }
 0x432   : > { %v2520_v59 = vadd.f32 %v2519_v62, %v2518_v7  ;;  %v2512_v60 = vrot.slane %v2511_v56, 4  ;;  %v2873_v4 = vunpack.c.l.bf16 %v2891_v55 }
 0x434   : > { %v2521_v37 = vrot.slane %v2520_v59, 2  ;;  %v2513_v18 = vadd.f32 %v2512_v60, %v2511_v56 }
 0x436   : > { %v2522_v61 = vadd.f32 %v2521_v37, %v2520_v59  ;;  %v2514_v54 = vrot.slane %v2513_v18, 2  ;;  %v2874_v59 = vunpack.c.h.bf16 %v2891_v55 }
 0x438   : > { %v2515_v3 = vadd.f32 %v2514_v54, %v2513_v18  ;;  %v2523_v27 = vrot.slane %v2522_v61, 1 }
 0x43a   : > { %v2516_v36 = vrot.slane %v2515_v3, 1  ;;  %v2524_v6 = vadd.f32 %v2523_v27, %v2522_v61  ;;  %v1427_v61 = vadd.f32 %v2874_v59, %v3621_v19  ;;  %v1426_v27 = vadd.f32 %v2873_v4, %v3624_v20 }
 0x43c   : > { %v2517_v16 = vadd.f32 %v2516_v36, %v2515_v3 }
 0x43e   : > { %v2608_v10 = vsel %vm2607_vm8, %v2517_v16, %v2606_v44  ;;  %v3073_v11 = vpop.f32.mrf.mxu1 }
 0x43f   : > { %v2610_v51 = vsel %vm2609_vm9, %v2524_v6, %v2608_v10  ;;  %v2462_v14 = vmul.f32 %v3073_v11, %v1423_v58 }
 0x440   : > { %2620 = vst.msk [vmem:[%s3863_s19] sm:$0xff] %vm1008_vm0, %v2610_v51  ;;  %v2414_v2 = vpop.f32.mrf.mxu1 }
 0x441   : > { %v2532_v0 = vsel %vm1008_vm0, %v2462_v14, 0.0  ;;  %v2461_v50 = vmul.f32 %v2414_v2, %v1422_v9  ;;  %v2892_v9 = vld [vmem:[%s3830_s18 + $0x38] sm:$0xff]  }
 0x442   : > { %v2533_v15 = vrot.slane %v2532_v0, 4  ;;  %v2877_v20 = vunpack.c.l.bf16 %v2892_v9 }
 0x443   : > { %v2525_v12 = vsel %vm1008_vm0, %v2461_v50, 0.0 }
 0x444   : > { %v2534_v57 = vadd.f32 %v2533_v15, %v2532_v0  ;;  %v2526_v41 = vrot.slane %v2525_v12, 4  ;;  %v2878_v15 = vunpack.c.h.bf16 %v2892_v9  ;;  %v1428_v8 = vadd.f32 %v2877_v20, %v3637_v39 }
 0x446   : > { %v2535_v29 = vrot.slane %v2534_v57, 2  ;;  %v2527_v42 = vadd.f32 %v2526_v41, %v2525_v12 }
 0x448   : > { %v2536_v21 = vadd.f32 %v2535_v29, %v2534_v57  ;;  %v2528_v22 = vrot.slane %v2527_v42, 2  ;;  %v1429_v29 = vadd.f32 %v2878_v15, %v3634_v35 }
 0x44a   : > { %v2537_v17 = vrot.slane %v2536_v21, 1  ;;  %v2529_v49 = vadd.f32 %v2528_v22, %v2527_v42 }
 0x44c   : > { %v2530_v26 = vrot.slane %v2529_v49, 1  ;;  %v2538_v43 = vadd.f32 %v2537_v17, %v2536_v21 }
 0x44e   : > { %v2531_v48 = vadd.f32 %v2530_v26, %v2529_v49 }
 0x450   : > { %v2611_v23 = vsel %vm2597_vm3, %v2538_v43, %v2531_v48 }
 0x451   : > { %v3076_v31 = vpop.f32.mrf.mxu1 }
 0x452   : > { %v2464_v34 = vmul.f32 %v3076_v31, %v1425_v30 }
 0x453   : > { %v2424_v5 = vpop.f32.mrf.mxu1 }
 0x454   : > { %v2546_v45 = vsel %vm1008_vm0, %v2464_v34, 0.0  ;;  %v2463_v33 = vmul.f32 %v2424_v5, %v1424_v52 }
 0x455   : > { %v2547_v40 = vrot.slane %v2546_v45, 4 }
 0x456   : > { %v2539_v24 = vsel %vm1008_vm0, %v2463_v33, 0.0 }
 0x457   : > { %v2548_v63 = vadd.f32 %v2547_v40, %v2546_v45  ;;  %v2540_v53 = vrot.slane %v2539_v24, 4 }
 0x459   : > { %v2549_v38 = vrot.slane %v2548_v63, 2  ;;  %v2541_v44 = vadd.f32 %v2540_v53, %v2539_v24 }
 0x45b   : > { %v2550_v47 = vadd.f32 %v2549_v38, %v2548_v63  ;;  %v2542_v7 = vrot.slane %v2541_v44, 2 }
 0x45d   : > { %v2543_v62 = vadd.f32 %v2542_v7, %v2541_v44  ;;  %v2551_v1 = vrot.slane %v2550_v47, 1 }
 0x45f   : > { %v2544_v56 = vrot.slane %v2543_v62, 1  ;;  %v2552_v37 = vadd.f32 %v2551_v1, %v2550_v47 }
 0x461   : > { %v2545_v60 = vadd.f32 %v2544_v56, %v2543_v62 }
 0x463   : > { %v2612_v18 = vsel %vm2599_vm4, %v2545_v60, %v2611_v23 }
 0x464   : > { %v3079_v54 = vpop.f32.mrf.mxu1  ;;  %v2613_v28 = vsel %vm2601_vm5, %v2552_v37, %v2612_v18 }
 0x465   : > { %v2466_v3 = vmul.f32 %v3079_v54, %v1427_v61 }
 0x466   : > { %v2434_v25 = vpop.f32.mrf.mxu1 }
 0x467   : > { %v2560_v36 = vsel %vm1008_vm0, %v2466_v3, 0.0  ;;  %v2465_v32 = vmul.f32 %v2434_v25, %v1426_v27 }
 0x468   : > { %v2561_v16 = vrot.slane %v2560_v36, 4 }
 0x469   : > { %v2553_v6 = vsel %vm1008_vm0, %v2465_v32, 0.0 }
 0x46a   : > { %v2562_v58 = vadd.f32 %v2561_v16, %v2560_v36  ;;  %v2554_v10 = vrot.slane %v2553_v6, 4 }
 0x46c   : > { %v2563_v11 = vrot.slane %v2562_v58, 2  ;;  %v2555_v51 = vadd.f32 %v2554_v10, %v2553_v6 }
 0x46e   : > { %v2564_v14 = vadd.f32 %v2563_v11, %v2562_v58  ;;  %v2556_v19 = vrot.slane %v2555_v51, 2 }
 0x470   : > { %v2557_v2 = vadd.f32 %v2556_v19, %v2555_v51  ;;  %v2565_v0 = vrot.slane %v2564_v14, 1 }
 0x472   : > { %v2558_v50 = vrot.slane %v2557_v2, 1  ;;  %v2566_v57 = vadd.f32 %v2565_v0, %v2564_v14 }
 0x474   : > { %v2559_v12 = vadd.f32 %v2558_v50, %v2557_v2 }
 0x476   : > { %v2614_v41 = vsel %vm2603_vm6, %v2559_v12, %v2613_v28 }
 0x477   : > { %v3082_v42 = vpop.f32.mrf.mxu1  ;;  %v2615_v21 = vsel %vm2605_vm7, %v2566_v57, %v2614_v41 }
 0x478   : > { %v2468_v22 = vmul.f32 %v3082_v42, %v1429_v29 }
 0x479   : > { %v2444_v17 = vpop.f32.mrf.mxu1 }
 0x47a   : > { %v2574_v49 = vsel %vm1008_vm0, %v2468_v22, 0.0  ;;  %v2467_v26 = vmul.f32 %v2444_v17, %v1428_v8 }
 0x47b   : > { %v2575_v46 = vrot.slane %v2574_v49, 4 }
 0x47c   : > { %v2567_v43 = vsel %vm1008_vm0, %v2467_v26, 0.0 }
 0x47d   : > { %v2576_v48 = vadd.f32 %v2575_v46, %v2574_v49  ;;  %v2568_v13 = vrot.slane %v2567_v43, 4 }
 0x47f   : > { %v2577_v23 = vrot.slane %v2576_v48, 2  ;;  %v2569_v30 = vadd.f32 %v2568_v13, %v2567_v43 }
 0x481   : > { %v2578_v31 = vadd.f32 %v2577_v23, %v2576_v48  ;;  %v2570_v35 = vrot.slane %v2569_v30, 2 }
 0x483   : > { %v2571_v34 = vadd.f32 %v2570_v35, %v2569_v30  ;;  %v2579_v52 = vrot.slane %v2578_v31, 1 }
 0x485   : > { %v2572_v5 = vrot.slane %v2571_v34, 1  ;;  %v2580_v33 = vadd.f32 %v2579_v52, %v2578_v31 }
 0x487   : > { %v2573_v45 = vadd.f32 %v2572_v5, %v2571_v34 }
 0x489   : > { %v2616_v39 = vsel %vm2607_vm8, %v2573_v45, %v2615_v21 }
 0x48a   : > { %v2617_v40 = vsel %vm2609_vm9, %v2580_v33, %v2616_v39 }
 0x48b   : > { %2621 = vst.msk [vmem:[%s3863_s19 + $0x8] sm:$0xff] %vm1008_vm0, %v2617_v40 }
 0x48c PF: > { %s24_s29 = sadd.s32 1, %s3197_s29  }
 0x48d   : > { %p21_p5 = scmp.ge.s32.totalorder %s24_s29, 4  }
 0x48f   :  { %23 = sbr.rel (!%p21_p5) target bundleno = 1 (0x1), region = 118 }

</bundles_post_ra>
